<compile_context>
chip_gen: v6e
topology: v6e:2x2x1
jax: 0.10.0
libtpu: 0.0.40
codegen_flags: <defaults>
</compile_context>

<pallas_src>
import math

import jax
import jax.numpy as jnp
from jax.experimental import pallas as pl
from jax.experimental.pallas import tpu as pltpu


def _layer_norm(y, gamma, beta, eps=1e-5):
    mu = jnp.mean(y, axis=-1, keepdims=True)
    var = jnp.mean((y - mu) ** 2, axis=-1, keepdims=True)
    return (y - mu) * jax.lax.rsqrt(var + eps) * gamma + beta


def make_encoder_layer_kernel(num_heads, d_model, seq_len, batch_tile, compute_dtype):
    H, D, S, BT = num_heads, d_model, seq_len, batch_tile
    dh = D // H
    rows = BT * S
    exact_f32 = jnp.dtype(compute_dtype) == jnp.dtype(jnp.float32)

    def split_heads(t2d):
        # (rows, D) -> (H*BT, S, dh) on the WHOLE slab, using only cheap,
        # well-supported layout ops: 2-D transpose, sublane-aligned leading-dim
        # split, last-two-dim 3-D swap, leading-dim reshape.
        t = t2d.T.reshape(H, dh, rows)          # (D, rows) -> (H, dh, rows)
        t = jnp.transpose(t, (0, 2, 1))         # (H, rows, dh)
        return t.reshape(H * BT, S, dh)         # pure leading-dim reshape

    def merge_heads(t3d):
        # (H*BT, S, dh) -> (rows, D): exact inverse of split_heads.
        t = t3d.reshape(H, rows, dh)
        t = jnp.transpose(t, (0, 2, 1))         # (H, dh, rows)
        return t.reshape(D, rows).T

    def kernel(x_ref,
               wq_ref, bq_ref, wk_ref, bk_ref, wv_ref, bv_ref, wo_ref, bo_ref,
               g1_ref, be1_ref, w1_ref, b1_ref, w2_ref, b2_ref, g2_ref, be2_ref,
               o_ref, x1_scr, ff_scr):
        j = pl.program_id(1)                    # Dff-tile index ("arbitrary" axis)

        def proj(a, w_ref, b_ref):
            return (jnp.dot(a, w_ref[...], preferred_element_type=jnp.float32)
                    + b_ref[...])

        # ---- Attention + residual + LayerNorm1: only on the first Dff step. ----
        @pl.when(j == 0)
        def _attention_and_ln1():
            x = x_ref[...]                      # (rows, D), f32 or compute dtype
            xf = x.astype(jnp.float32)
            xc = x.astype(compute_dtype)

            # QKV projections: one (rows, D) x (D, D) MXU matmul each (big M dim).
            # 1/sqrt(dh) has been folded into wq/bq in the wrapper.
            q = proj(xc, wq_ref, bq_ref)
            k = proj(xc, wk_ref, bk_ref)
            v = proj(xc, wv_ref, bv_ref)

            # ONE head-and-batch-batched contraction (batch dim = H*BT): no per-batch
            # Python loop, no per-element transposes, no concatenate.
            qh = split_heads(q).astype(compute_dtype)    # (H*BT, S, dh)
            kh = split_heads(k).astype(compute_dtype)
            vh = split_heads(v).astype(compute_dtype)

            s = jnp.einsum("bqd,bkd->bqk", qh, kh,
                           preferred_element_type=jnp.float32)      # (H*BT, S, S)
            s = s - jnp.max(s, axis=-1, keepdims=True)
            p = jnp.exp(s)                                           # f32 softmax math
            denom = jnp.sum(p, axis=-1, keepdims=True)               # (H*BT, S, 1)
            ctx = jnp.einsum("bqk,bkd->bqd", p.astype(compute_dtype), vh,
                             preferred_element_type=jnp.float32)     # (H*BT, S, dh)
            # Normalise the small context tensor after PV: exact in the f32 path,
            # EUP approx reciprocal only on the bf16 fast path.
            if exact_f32:
                ctx = ctx / denom
            else:
                ctx = ctx * pl.reciprocal(denom, approx=True)

            attn = merge_heads(ctx)                                  # (rows, D)
            attn = proj(attn.astype(compute_dtype), wo_ref, bo_ref)

            x1_scr[...] = _layer_norm(xf + attn, g1_ref[...], be1_ref[...])
            ff_scr[...] = jnp.zeros_like(ff_scr)

        # ---- Position-wise FFN, streamed over Dff tiles (accumulated in f32). ----
        x1c = x1_scr[...].astype(compute_dtype)
        h1 = jnp.dot(x1c, w1_ref[...], preferred_element_type=jnp.float32) + b1_ref[...]
        h1 = jnp.maximum(h1, 0.0)
        ff_scr[...] += jnp.dot(h1.astype(compute_dtype), w2_ref[...],
                               preferred_element_type=jnp.float32)

        # ---- Residual + LayerNorm2 + single full-tile store on the last Dff step. ----
        @pl.when(j == pl.num_programs(1) - 1)
        def _ln2_and_store():
            ff = ff_scr[...] + b2_ref[...]
            o_ref[...] = _layer_norm(x1_scr[...] + ff,
                                     g2_ref[...], be2_ref[...]).astype(o_ref.dtype)

    return kernel


# ----------------------------- VMEM budgeting --------------------------------

def _vmem_limit_bytes():
    """Per-generation VMEM target: ~80% of physical, capped at 100 MiB.
    ~100 MiB on v5e/v6e (128 MiB physical), ~51 MiB on v7x (64 MiB)."""
    cap = 128 * 1024 * 1024
    try:
        info = pltpu.get_tpu_info()
        cap = int(getattr(info, "vmem_capacity_bytes", cap))
    except Exception:
        pass
    return min(int(cap * 0.8), 100 * 1024 * 1024)


def _step_activation_bytes(rows, d_model, dff_tile, seq, num_heads, compute_itemsize):
    f32 = 4
    b = 2 * rows * d_model * compute_itemsize    # input tile, double-buffered
    b += 2 * rows * d_model * f32                # output tile, double-buffered
    b += 2 * rows * d_model * f32                # x1 + ff accumulator scratch
    b += 4 * rows * d_model * f32                # q, k, v, attn slabs
    b += num_heads * rows * seq * f32            # (H*BT, S, S) scores/probs
    b += rows * dff_tile * f32                   # h1 tile
    return b


def _weight_vmem_bytes(d_model, dff_tile, compute_itemsize, single_buffered=True):
    f32 = 4
    nbuf = 1 if single_buffered else 2
    b = nbuf * 4 * d_model * d_model * compute_itemsize            # wq, wk, wv, wo
    b += nbuf * 9 * d_model * f32                                   # biases + LN params
    b += 2 * (2 * d_model * dff_tile * compute_itemsize + dff_tile * f32)  # w1/b1/w2 tiles
    return b


def _pick_dff_tile(d_ff, max_tile=1024):
    """Largest 128-multiple divisor of d_ff that is <= max_tile (untiled if d_ff is small)."""
    if d_ff <= max_tile:
        return d_ff
    candidates = [t for t in range(128, max_tile + 1, 128) if d_ff % t == 0]
    return max(candidates) if candidates else d_ff


def _pick_batch_tile(batch, seq, act_bytes_fn, act_budget_bytes, target_rows=512):
    """Largest batch tile that (a) leaves >= 2 grid steps whenever batch >= 2 (second
    TensorCore on v7x + pipelining), (b) fits the per-step activation VMEM budget and
    (c) stops growing near ~target_rows matmul rows (512 amortises per-step overhead
    and is a multiple of both 128 (v5e MXU) and 256 (v6e/v7x MXU))."""
    divisors = [d for d in range(1, batch + 1) if batch % d == 0]
    if batch >= 2:
        divisors = [d for d in divisors if batch // d >= 2]
    best = divisors[0]
    for bt in divisors:                          # ascending
        if act_bytes_fn(bt * seq) > act_budget_bytes:
            break
        best = bt
        if bt * seq >= target_rows:
            break
    return best


_BIG_WEIGHTS = ("wq", "wk", "wv", "wo", "w1", "w2")
_PARAM_ORDER = ("wq", "bq", "wk", "bk", "wv", "bv", "wo", "bo",
                "g1", "be1", "w1", "b1", "w2", "b2", "g2", "be2")


def encoder_layer_pallas(x, params, num_heads, compute_dtype=jnp.float32,
                         dff_tile=None, target_rows=512):
    B, S, D = x.shape
    d_ff = params["w1"].shape[1]
    dh = D // num_heads
    scale = 1.0 / math.sqrt(dh)
    itemsize = jnp.dtype(compute_dtype).itemsize

    if dff_tile is None:
        dff_tile = _pick_dff_tile(d_ff)
    assert d_ff % dff_tile == 0
    n_dff = d_ff // dff_tile

    vmem_limit = _vmem_limit_bytes()
    act_budget = max(vmem_limit - _weight_vmem_bytes(D, dff_tile, itemsize) - (4 << 20),
                     1 << 20)
    BT = _pick_batch_tile(
        B, S,
        lambda r: _step_activation_bytes(r, D, dff_tile, S, num_heads, itemsize),
        act_budget, target_rows)
    rows = BT * S

    # Carry the activation in the compute dtype when its tile is aligned to the packed
    # sublane tiling (16 rows for bf16); otherwise keep f32 (e.g. toy shapes).
    sublane = 8 * (4 // itemsize)
    in_dtype = compute_dtype if rows % sublane == 0 else jnp.float32
    x2 = x.reshape(B * S, D).astype(in_dtype)

    # Cast the big weight matrices to the matmul compute dtype in the wrapper (halves
    # weight HBM->VMEM DMA; bf16 is MXU-native on all generations incl. v5e).  Biases
    # and LayerNorm params stay f32.  The 1/sqrt(dh) scale is folded into wq/bq here.
    def prep(name):
        p = params[name].astype(jnp.float32)
        if name in ("wq", "bq"):
            p = p * scale
        if name in _BIG_WEIGHTS:
            p = p.astype(compute_dtype)
        return p

    param_arrays = [prep(n) for n in _PARAM_ORDER]
    kernel = make_encoder_layer_kernel(num_heads, D, S, BT, compute_dtype)

    def build(single_buffer_weights):
        def const_spec(arr):
            nd = arr.ndim
            idx = lambda i, j, _nd=nd: (0,) * _nd
            if single_buffer_weights:
                # Grid-invariant weights are never re-fetched: single-buffer them to
                # halve their VMEM footprint (matters on v7x's 64 MiB VMEM).
                return pl.BlockSpec(arr.shape, idx, pipeline_mode=pl.Buffered(1))
            return pl.BlockSpec(arr.shape, idx)

        dff_specs = {
            "w1": pl.BlockSpec((D, dff_tile), lambda i, j: (0, j)),
            "b1": pl.BlockSpec((1, dff_tile), lambda i, j: (0, j)),
            "w2": pl.BlockSpec((dff_tile, D), lambda i, j: (j, 0)),
        }
        param_specs = [dff_specs[n] if n in dff_specs else const_spec(a)
                       for n, a in zip(_PARAM_ORDER, param_arrays)]

        return pl.pallas_call(
            kernel,
            out_shape=jax.ShapeDtypeStruct((B * S, D), jnp.float32),
            grid_spec=pltpu.PrefetchScalarGridSpec(
                num_scalar_prefetch=0,
                grid=(B // BT, n_dff),
                in_specs=[pl.BlockSpec((rows, D), lambda i, j: (i, 0))] + param_specs,
                out_specs=pl.BlockSpec((rows, D), lambda i, j: (i, 0)),
                scratch_shapes=[pltpu.VMEM((rows, D), jnp.float32),   # x1 (post-LN1)
                                pltpu.VMEM((rows, D), jnp.float32)],  # FFN accumulator
            ),
            compiler_params=pltpu.CompilerParams(
                dimension_semantics=("parallel", "arbitrary"),
                vmem_limit_bytes=vmem_limit),
        )

    try:
        out2 = build(single_buffer_weights=True)(x2, *param_arrays)
    except Exception:
        # pipeline_mode=pl.Buffered(1) unsupported on this jax build: fall back to
        # default double-buffered weight specs (extra VMEM only, same semantics).
        out2 = build(single_buffer_weights=False)(x2, *param_arrays)
    return out2.reshape(B, S, D)


def encoder_layer_ref(x, params, num_heads):
    """Pure-JAX reference with identical semantics (f32 everywhere)."""
    B, S, D = x.shape
    dh = D // num_heads
    q = x @ params["wq"] + params["bq"]
    k = x @ params["wk"] + params["bk"]
    v = x @ params["wv"] + params["bv"]
    qh = q.reshape(B, S, num_heads, dh)
    kh = k.reshape(B, S, num_heads, dh)
    vh = v.reshape(B, S, num_heads, dh)
    s = jnp.einsum("bqhd,bkhd->bhqk", qh, kh) / math.sqrt(dh)
    p = jax.nn.softmax(s, axis=-1)
    attn = jnp.einsum("bhqk,bkhd->bqhd", p, vh).reshape(B, S, D)
    attn = attn @ params["wo"] + params["bo"]
    x1 = _layer_norm(x + attn, params["g1"], params["be1"])
    ff = jnp.maximum(x1 @ params["w1"] + params["b1"], 0.0) @ params["w2"] + params["b2"]
    return _layer_norm(x1 + ff, params["g2"], params["be2"])


def init_params(key, d_model, d_ff):
    ks = jax.random.split(key, 6)
    sd = 0.05
    return {
        "wq": jax.random.normal(ks[0], (d_model, d_model), jnp.float32) * sd,
        "wk": jax.random.normal(ks[1], (d_model, d_model), jnp.float32) * sd,
        "wv": jax.random.normal(ks[2], (d_model, d_model), jnp.float32) * sd,
        "wo": jax.random.normal(ks[3], (d_model, d_model), jnp.float32) * sd,
        "bq": jnp.zeros((1, d_model), jnp.float32),
        "bk": jnp.zeros((1, d_model), jnp.float32),
        "bv": jnp.zeros((1, d_model), jnp.float32),
        "bo": jnp.zeros((1, d_model), jnp.float32),
        "w1": jax.random.normal(ks[4], (d_model, d_ff), jnp.float32) * sd,
        "b1": jnp.zeros((1, d_ff), jnp.float32),
        "w2": jax.random.normal(ks[5], (d_ff, d_model), jnp.float32) * sd,
        "b2": jnp.zeros((1, d_model), jnp.float32),
        "g1": jnp.ones((1, d_model), jnp.float32),
        "be1": jnp.zeros((1, d_model), jnp.float32),
        "g2": jnp.ones((1, d_model), jnp.float32),
        "be2": jnp.zeros((1, d_model), jnp.float32),
    }


if __name__ == "__main__":
    # Small shapes consistent with the module: batch=2, seq=8, d_model=32, d_ff=64, heads=4.
    B, S, D, DFF, H = 2, 8, 32, 64, 4
    key = jax.random.PRNGKey(0)
    kx, kp, kp2 = jax.random.split(key, 3)
    x = jax.random.normal(kx, (B, S, D), jnp.float32)
    params = init_params(kp, D, DFF)

    # TODO(synk): dropout (train mode) and attention-mask broadcasting are not
    # implemented; this matches the eval-mode forward with mask=None.
    ref = encoder_layer_ref(x, params, H)

    # f32 matmul path (exact softmax division -> tight check).
    out = jax.block_until_ready(encoder_layer_pallas(x, params, H))
    assert out.shape == (B, S, D)
    assert jnp.allclose(out, ref, atol=5e-3, rtol=5e-3), "f32 kernel mismatch vs reference"

    # bf16 matmul operands (fast path on v5e/v6e/v7x); softmax / LN / accumulation stay f32.
    out_bf16 = jax.block_until_ready(
        encoder_layer_pallas(x, params, H, compute_dtype=jnp.bfloat16))
    assert jnp.allclose(out_bf16, ref, atol=3e-2, rtol=3e-2), "bf16 kernel mismatch vs reference"

    # Exercise the Dff-tiled accumulation path (grid axis 1 has 2 steps) at a small size
    # where the streamed w1/w2 tiles still satisfy the 128-lane block constraint.
    params_big_ff = init_params(kp2, D, 256)
    ref_big = encoder_layer_ref(x, params_big_ff, H)
    out_big = jax.block_until_ready(
        encoder_layer_pallas(x, params_big_ff, H, dff_tile=128))
    assert jnp.allclose(out_big, ref_big, atol=5e-3, rtol=5e-3), "Dff-tiled kernel mismatch"

    print("KERNEL_OK")
</pallas_src>

<mosaic_0001>
module attributes {stable_mosaic.version = 11 : i64} {
  func.func @kernel(%arg0: i32, %arg1: i32, %arg2: memref<8x32xf32, #tpu.memory_space<vmem>>, %arg3: memref<32x32xf32, #tpu.memory_space<vmem>>, %arg4: memref<1x32xf32, #tpu.memory_space<vmem>>, %arg5: memref<32x32xf32, #tpu.memory_space<vmem>>, %arg6: memref<1x32xf32, #tpu.memory_space<vmem>>, %arg7: memref<32x32xf32, #tpu.memory_space<vmem>>, %arg8: memref<1x32xf32, #tpu.memory_space<vmem>>, %arg9: memref<32x32xf32, #tpu.memory_space<vmem>>, %arg10: memref<1x32xf32, #tpu.memory_space<vmem>>, %arg11: memref<1x32xf32, #tpu.memory_space<vmem>>, %arg12: memref<1x32xf32, #tpu.memory_space<vmem>>, %arg13: memref<32x64xf32, #tpu.memory_space<vmem>>, %arg14: memref<1x64xf32, #tpu.memory_space<vmem>>, %arg15: memref<64x32xf32, #tpu.memory_space<vmem>>, %arg16: memref<1x32xf32, #tpu.memory_space<vmem>>, %arg17: memref<1x32xf32, #tpu.memory_space<vmem>>, %arg18: memref<1x32xf32, #tpu.memory_space<vmem>>, %arg19: memref<8x32xf32, #tpu.memory_space<vmem>>, %arg20: memref<8x32xf32, #tpu.memory_space<vmem>>, %arg21: memref<8x32xf32, #tpu.memory_space<vmem>>) attributes {dimension_semantics = [#tpu.dimension_semantics<parallel>, #tpu.dimension_semantics<arbitrary>], iteration_bounds = array<i64: 2, 1>, scalar_prefetch = 0 : i64, scratch_operands = 2 : i64, tpu.core_type = #tpu.core_type<tc>, window_params = [{transform_indices = @transform_0, window_bounds = array<i64: 8, 32>}, {pipeline_mode = #tpu.pipeline_mode<synchronous>, transform_indices = @transform_1, window_bounds = array<i64: 32, 32>}, {pipeline_mode = #tpu.pipeline_mode<synchronous>, transform_indices = @transform_2, window_bounds = array<i64: 1, 32>}, {pipeline_mode = #tpu.pipeline_mode<synchronous>, transform_indices = @transform_3, window_bounds = array<i64: 32, 32>}, {pipeline_mode = #tpu.pipeline_mode<synchronous>, transform_indices = @transform_4, window_bounds = array<i64: 1, 32>}, {pipeline_mode = #tpu.pipeline_mode<synchronous>, transform_indices = @transform_5, window_bounds = array<i64: 32, 32>}, {pipeline_mode = #tpu.pipeline_mode<synchronous>, transform_indices = @transform_6, window_bounds = array<i64: 1, 32>}, {pipeline_mode = #tpu.pipeline_mode<synchronous>, transform_indices = @transform_7, window_bounds = array<i64: 32, 32>}, {pipeline_mode = #tpu.pipeline_mode<synchronous>, transform_indices = @transform_8, window_bounds = array<i64: 1, 32>}, {pipeline_mode = #tpu.pipeline_mode<synchronous>, transform_indices = @transform_9, window_bounds = array<i64: 1, 32>}, {pipeline_mode = #tpu.pipeline_mode<synchronous>, transform_indices = @transform_10, window_bounds = array<i64: 1, 32>}, {transform_indices = @transform_11, window_bounds = array<i64: 32, 64>}, {transform_indices = @transform_12, window_bounds = array<i64: 1, 64>}, {transform_indices = @transform_13, window_bounds = array<i64: 64, 32>}, {pipeline_mode = #tpu.pipeline_mode<synchronous>, transform_indices = @transform_14, window_bounds = array<i64: 1, 32>}, {pipeline_mode = #tpu.pipeline_mode<synchronous>, transform_indices = @transform_15, window_bounds = array<i64: 1, 32>}, {pipeline_mode = #tpu.pipeline_mode<synchronous>, transform_indices = @transform_16, window_bounds = array<i64: 1, 32>}, {transform_indices = @transform_17, window_bounds = array<i64: 8, 32>}]} {
    %c0_i32 = arith.constant 0 : i32
    %0 = arith.cmpi eq, %arg1, %c0_i32 : i32
    %1 = arith.extui %0 : i1 to i32
    %c0_i32_0 = arith.constant 0 : i32
    %2 = arith.cmpi ne, %1, %c0_i32_0 : i32
    scf.if %2 {
      %c0_16 = arith.constant 0 : index
      %c0_17 = arith.constant 0 : index
      %19 = vector.load %arg2[%c0_16, %c0_17] : memref<8x32xf32, #tpu.memory_space<vmem>>, vector<8x32xf32>
      %c0_18 = arith.constant 0 : index
      %c0_19 = arith.constant 0 : index
      %20 = vector.load %arg3[%c0_18, %c0_19] : memref<32x32xf32, #tpu.memory_space<vmem>>, vector<32x32xf32>
      %cst_20 = arith.constant dense<0.000000e+00> : vector<8x32xf32>
      %21 = tpu.matmul %19, %20, %cst_20 {dimension_numbers = #tpu.dot_dimension_numbers<[1], [0], [0], [1], [0, 0, 1, 1], [], []>} : vector<8x32xf32>, vector<32x32xf32>, vector<8x32xf32> -> vector<8x32xf32>
      %c0_21 = arith.constant 0 : index
      %c0_22 = arith.constant 0 : index
      %22 = vector.load %arg4[%c0_21, %c0_22] : memref<1x32xf32, #tpu.memory_space<vmem>>, vector<1x32xf32>
      %23 = vector.broadcast %22 : vector<1x32xf32> to vector<8x32xf32>
      %24 = arith.addf %21, %23 : vector<8x32xf32>
      %c0_23 = arith.constant 0 : index
      %c0_24 = arith.constant 0 : index
      %25 = vector.load %arg5[%c0_23, %c0_24] : memref<32x32xf32, #tpu.memory_space<vmem>>, vector<32x32xf32>
      %cst_25 = arith.constant dense<0.000000e+00> : vector<8x32xf32>
      %26 = tpu.matmul %19, %25, %cst_25 {dimension_numbers = #tpu.dot_dimension_numbers<[1], [0], [0], [1], [0, 0, 1, 1], [], []>} : vector<8x32xf32>, vector<32x32xf32>, vector<8x32xf32> -> vector<8x32xf32>
      %c0_26 = arith.constant 0 : index
      %c0_27 = arith.constant 0 : index
      %27 = vector.load %arg6[%c0_26, %c0_27] : memref<1x32xf32, #tpu.memory_space<vmem>>, vector<1x32xf32>
      %28 = vector.broadcast %27 : vector<1x32xf32> to vector<8x32xf32>
      %29 = arith.addf %26, %28 : vector<8x32xf32>
      %c0_28 = arith.constant 0 : index
      %c0_29 = arith.constant 0 : index
      %30 = vector.load %arg7[%c0_28, %c0_29] : memref<32x32xf32, #tpu.memory_space<vmem>>, vector<32x32xf32>
      %cst_30 = arith.constant dense<0.000000e+00> : vector<8x32xf32>
      %31 = tpu.matmul %19, %30, %cst_30 {dimension_numbers = #tpu.dot_dimension_numbers<[1], [0], [0], [1], [0, 0, 1, 1], [], []>} : vector<8x32xf32>, vector<32x32xf32>, vector<8x32xf32> -> vector<8x32xf32>
      %c0_31 = arith.constant 0 : index
      %c0_32 = arith.constant 0 : index
      %32 = vector.load %arg8[%c0_31, %c0_32] : memref<1x32xf32, #tpu.memory_space<vmem>>, vector<1x32xf32>
      %33 = vector.broadcast %32 : vector<1x32xf32> to vector<8x32xf32>
      %34 = arith.addf %31, %33 : vector<8x32xf32>
      %35 = tpu.transpose %24, [1, 0] : vector<8x32xf32> -> vector<32x8xf32>
      %36 = vector.shape_cast %35 : vector<32x8xf32> to vector<4x8x8xf32>
      %37 = tpu.transpose %36, [0, 2, 1] : vector<4x8x8xf32> -> vector<4x8x8xf32>
      %38 = tpu.transpose %29, [1, 0] : vector<8x32xf32> -> vector<32x8xf32>
      %39 = vector.shape_cast %38 : vector<32x8xf32> to vector<4x8x8xf32>
      %40 = tpu.transpose %39, [0, 2, 1] : vector<4x8x8xf32> -> vector<4x8x8xf32>
      %41 = tpu.transpose %34, [1, 0] : vector<8x32xf32> -> vector<32x8xf32>
      %42 = vector.shape_cast %41 : vector<32x8xf32> to vector<4x8x8xf32>
      %43 = tpu.transpose %42, [0, 2, 1] : vector<4x8x8xf32> -> vector<4x8x8xf32>
      "tpu.trace_start"() <{level = 10 : i32, message = "bqd,bkd->bqk"}> : () -> ()
      %cst_33 = arith.constant dense<0.000000e+00> : vector<4x8x8xf32>
      %44 = tpu.matmul %37, %40, %cst_33 {dimension_numbers = #tpu.dot_dimension_numbers<[2], [2], [1], [1], [0, 0, 0, 1, 1, 1], [0], [0]>} : vector<4x8x8xf32>, vector<4x8x8xf32>, vector<4x8x8xf32> -> vector<4x8x8xf32>
      "tpu.trace_stop"() : () -> ()
      %cst_34 = arith.constant dense<0xFF800000> : vector<4x8xf32>
      %45 = vector.multi_reduction <maximumf>, %44, %cst_34 [2] : vector<4x8x8xf32> to vector<4x8xf32>
      %46 = vector.shape_cast %45 : vector<4x8xf32> to vector<4x8x1xf32>
      %47 = vector.broadcast %46 : vector<4x8x1xf32> to vector<4x8x8xf32>
      %48 = arith.subf %44, %47 : vector<4x8x8xf32>
      %49 = math.exp %48 : vector<4x8x8xf32>
      %cst_35 = arith.constant dense<0.000000e+00> : vector<4x8xf32>
      %50 = vector.multi_reduction <add>, %49, %cst_35 [2] : vector<4x8x8xf32> to vector<4x8xf32>
      %51 = vector.shape_cast %50 : vector<4x8xf32> to vector<4x8x1xf32>
      "tpu.trace_start"() <{level = 10 : i32, message = "bqk,bkd->bqd"}> : () -> ()
      %cst_36 = arith.constant dense<0.000000e+00> : vector<4x8x8xf32>
      %52 = tpu.matmul %49, %43, %cst_36 {dimension_numbers = #tpu.dot_dimension_numbers<[2], [1], [1], [2], [0, 0, 0, 1, 1, 2], [0], [0]>} : vector<4x8x8xf32>, vector<4x8x8xf32>, vector<4x8x8xf32> -> vector<4x8x8xf32>
      "tpu.trace_stop"() : () -> ()
      %53 = vector.broadcast %51 : vector<4x8x1xf32> to vector<4x8x8xf32>
      %54 = arith.divf %52, %53 : vector<4x8x8xf32>
      %55 = tpu.transpose %54, [0, 2, 1] : vector<4x8x8xf32> -> vector<4x8x8xf32>
      %56 = vector.shape_cast %55 : vector<4x8x8xf32> to vector<32x8xf32>
      %57 = tpu.transpose %56, [1, 0] : vector<32x8xf32> -> vector<8x32xf32>
      %c0_37 = arith.constant 0 : index
      %c0_38 = arith.constant 0 : index
      %58 = vector.load %arg9[%c0_37, %c0_38] : memref<32x32xf32, #tpu.memory_space<vmem>>, vector<32x32xf32>
      %cst_39 = arith.constant dense<0.000000e+00> : vector<8x32xf32>
      %59 = tpu.matmul %57, %58, %cst_39 {dimension_numbers = #tpu.dot_dimension_numbers<[1], [0], [0], [1], [0, 0, 1, 1], [], []>} : vector<8x32xf32>, vector<32x32xf32>, vector<8x32xf32> -> vector<8x32xf32>
      %c0_40 = arith.constant 0 : index
      %c0_41 = arith.constant 0 : index
      %60 = vector.load %arg10[%c0_40, %c0_41] : memref<1x32xf32, #tpu.memory_space<vmem>>, vector<1x32xf32>
      %61 = vector.broadcast %60 : vector<1x32xf32> to vector<8x32xf32>
      %62 = arith.addf %59, %61 : vector<8x32xf32>
      %63 = arith.addf %19, %62 : vector<8x32xf32>
      %c0_42 = arith.constant 0 : index
      %c0_43 = arith.constant 0 : index
      %64 = vector.load %arg11[%c0_42, %c0_43] : memref<1x32xf32, #tpu.memory_space<vmem>>, vector<1x32xf32>
      %c0_44 = arith.constant 0 : index
      %c0_45 = arith.constant 0 : index
      %65 = vector.load %arg12[%c0_44, %c0_45] : memref<1x32xf32, #tpu.memory_space<vmem>>, vector<1x32xf32>
      %cst_46 = arith.constant dense<0.000000e+00> : vector<8xf32>
      %66 = vector.multi_reduction <add>, %63, %cst_46 [1] : vector<8x32xf32> to vector<8xf32>
      %67 = vector.shape_cast %66 : vector<8xf32> to vector<8x1xf32>
      %cst_47 = arith.constant 3.200000e+01 : f32
      %68 = vector.broadcast %cst_47 : f32 to vector<8x1xf32>
      %69 = arith.divf %67, %68 : vector<8x1xf32>
      %70 = vector.broadcast %69 : vector<8x1xf32> to vector<8x32xf32>
      %71 = arith.subf %63, %70 : vector<8x32xf32>
      %72 = arith.mulf %71, %71 : vector<8x32xf32>
      %cst_48 = arith.constant dense<0.000000e+00> : vector<8xf32>
      %73 = vector.multi_reduction <add>, %72, %cst_48 [1] : vector<8x32xf32> to vector<8xf32>
      %74 = vector.shape_cast %73 : vector<8xf32> to vector<8x1xf32>
      %cst_49 = arith.constant 3.200000e+01 : f32
      %75 = vector.broadcast %cst_49 : f32 to vector<8x1xf32>
      %76 = arith.divf %74, %75 : vector<8x1xf32>
      %77 = vector.broadcast %69 : vector<8x1xf32> to vector<8x32xf32>
      %78 = arith.subf %63, %77 : vector<8x32xf32>
      %cst_50 = arith.constant 9.99999974E-6 : f32
      %79 = vector.broadcast %cst_50 : f32 to vector<8x1xf32>
      %80 = arith.addf %76, %79 : vector<8x1xf32>
      %81 = math.rsqrt %80 : vector<8x1xf32>
      %82 = vector.broadcast %81 : vector<8x1xf32> to vector<8x32xf32>
      %83 = arith.mulf %78, %82 : vector<8x32xf32>
      %84 = vector.broadcast %64 : vector<1x32xf32> to vector<8x32xf32>
      %85 = arith.mulf %83, %84 : vector<8x32xf32>
      %86 = vector.broadcast %65 : vector<1x32xf32> to vector<8x32xf32>
      %87 = arith.addf %85, %86 : vector<8x32xf32>
      %c0_51 = arith.constant 0 : index
      %c0_52 = arith.constant 0 : index
      %88 = vector.load %arg20[%c0_51, %c0_52] : memref<8x32xf32, #tpu.memory_space<vmem>>, vector<8x32xf32>
      tpu.vector_store %arg20[%c0_51, %c0_52], %87 {strides = array<i32>} : memref<8x32xf32, #tpu.memory_space<vmem>>, vector<8x32xf32>,
      %cst_53 = arith.constant 0.000000e+00 : f32
      %89 = vector.broadcast %cst_53 : f32 to vector<8x32xf32>
      %c0_54 = arith.constant 0 : index
      %c0_55 = arith.constant 0 : index
      %90 = vector.load %arg21[%c0_54, %c0_55] : memref<8x32xf32, #tpu.memory_space<vmem>>, vector<8x32xf32>
      tpu.vector_store %arg21[%c0_54, %c0_55], %89 {strides = array<i32>} : memref<8x32xf32, #tpu.memory_space<vmem>>, vector<8x32xf32>,
    } else {
    }
    %c0 = arith.constant 0 : index
    %c0_1 = arith.constant 0 : index
    %3 = vector.load %arg20[%c0, %c0_1] : memref<8x32xf32, #tpu.memory_space<vmem>>, vector<8x32xf32>
    %c0_2 = arith.constant 0 : index
    %c0_3 = arith.constant 0 : index
    %4 = vector.load %arg13[%c0_2, %c0_3] : memref<32x64xf32, #tpu.memory_space<vmem>>, vector<32x64xf32>
    %cst = arith.constant dense<0.000000e+00> : vector<8x64xf32>
    %5 = tpu.matmul %3, %4, %cst {dimension_numbers = #tpu.dot_dimension_numbers<[1], [0], [0], [1], [0, 0, 1, 1], [], []>} : vector<8x32xf32>, vector<32x64xf32>, vector<8x64xf32> -> vector<8x64xf32>
    %c0_4 = arith.constant 0 : index
    %c0_5 = arith.constant 0 : index
    %6 = vector.load %arg14[%c0_4, %c0_5] : memref<1x64xf32, #tpu.memory_space<vmem>>, vector<1x64xf32>
    %7 = vector.broadcast %6 : vector<1x64xf32> to vector<8x64xf32>
    %8 = arith.addf %5, %7 : vector<8x64xf32>
    %cst_6 = arith.constant 0.000000e+00 : f32
    %9 = vector.broadcast %cst_6 : f32 to vector<8x64xf32>
    %10 = arith.maximumf %8, %9 : vector<8x64xf32>
    %c0_7 = arith.constant 0 : index
    %c0_8 = arith.constant 0 : index
    %11 = vector.load %arg21[%c0_7, %c0_8] : memref<8x32xf32, #tpu.memory_space<vmem>>, vector<8x32xf32>
    %c0_9 = arith.constant 0 : index
    %c0_10 = arith.constant 0 : index
    %12 = vector.load %arg15[%c0_9, %c0_10] : memref<64x32xf32, #tpu.memory_space<vmem>>, vector<64x32xf32>
    %cst_11 = arith.constant dense<0.000000e+00> : vector<8x32xf32>
    %13 = tpu.matmul %10, %12, %cst_11 {dimension_numbers = #tpu.dot_dimension_numbers<[1], [0], [0], [1], [0, 0, 1, 1], [], []>} : vector<8x64xf32>, vector<64x32xf32>, vector<8x32xf32> -> vector<8x32xf32>
    %14 = arith.addf %11, %13 : vector<8x32xf32>
    %c0_12 = arith.constant 0 : index
    %c0_13 = arith.constant 0 : index
    %15 = vector.load %arg21[%c0_12, %c0_13] : memref<8x32xf32, #tpu.memory_space<vmem>>, vector<8x32xf32>
    tpu.vector_store %arg21[%c0_12, %c0_13], %14 {strides = array<i32>} : memref<8x32xf32, #tpu.memory_space<vmem>>, vector<8x32xf32>,
    %c0_i32_14 = arith.constant 0 : i32
    %16 = arith.cmpi eq, %arg1, %c0_i32_14 : i32
    %17 = arith.extui %16 : i1 to i32
    %c0_i32_15 = arith.constant 0 : i32
    %18 = arith.cmpi ne, %17, %c0_i32_15 : i32
    scf.if %18 {
      %c0_16 = arith.constant 0 : index
      %c0_17 = arith.constant 0 : index
      %19 = vector.load %arg21[%c0_16, %c0_17] : memref<8x32xf32, #tpu.memory_space<vmem>>, vector<8x32xf32>
      %c0_18 = arith.constant 0 : index
      %c0_19 = arith.constant 0 : index
      %20 = vector.load %arg16[%c0_18, %c0_19] : memref<1x32xf32, #tpu.memory_space<vmem>>, vector<1x32xf32>
      %21 = vector.broadcast %20 : vector<1x32xf32> to vector<8x32xf32>
      %22 = arith.addf %19, %21 : vector<8x32xf32>
      %c0_20 = arith.constant 0 : index
      %c0_21 = arith.constant 0 : index
      %23 = vector.load %arg20[%c0_20, %c0_21] : memref<8x32xf32, #tpu.memory_space<vmem>>, vector<8x32xf32>
      %24 = arith.addf %23, %22 : vector<8x32xf32>
      %c0_22 = arith.constant 0 : index
      %c0_23 = arith.constant 0 : index
      %25 = vector.load %arg17[%c0_22, %c0_23] : memref<1x32xf32, #tpu.memory_space<vmem>>, vector<1x32xf32>
      %c0_24 = arith.constant 0 : index
      %c0_25 = arith.constant 0 : index
      %26 = vector.load %arg18[%c0_24, %c0_25] : memref<1x32xf32, #tpu.memory_space<vmem>>, vector<1x32xf32>
      %cst_26 = arith.constant dense<0.000000e+00> : vector<8xf32>
      %27 = vector.multi_reduction <add>, %24, %cst_26 [1] : vector<8x32xf32> to vector<8xf32>
      %28 = vector.shape_cast %27 : vector<8xf32> to vector<8x1xf32>
      %cst_27 = arith.constant 3.200000e+01 : f32
      %29 = vector.broadcast %cst_27 : f32 to vector<8x1xf32>
      %30 = arith.divf %28, %29 : vector<8x1xf32>
      %31 = vector.broadcast %30 : vector<8x1xf32> to vector<8x32xf32>
      %32 = arith.subf %24, %31 : vector<8x32xf32>
      %33 = arith.mulf %32, %32 : vector<8x32xf32>
      %cst_28 = arith.constant dense<0.000000e+00> : vector<8xf32>
      %34 = vector.multi_reduction <add>, %33, %cst_28 [1] : vector<8x32xf32> to vector<8xf32>
      %35 = vector.shape_cast %34 : vector<8xf32> to vector<8x1xf32>
      %cst_29 = arith.constant 3.200000e+01 : f32
      %36 = vector.broadcast %cst_29 : f32 to vector<8x1xf32>
      %37 = arith.divf %35, %36 : vector<8x1xf32>
      %38 = vector.broadcast %30 : vector<8x1xf32> to vector<8x32xf32>
      %39 = arith.subf %24, %38 : vector<8x32xf32>
      %cst_30 = arith.constant 9.99999974E-6 : f32
      %40 = vector.broadcast %cst_30 : f32 to vector<8x1xf32>
      %41 = arith.addf %37, %40 : vector<8x1xf32>
      %42 = math.rsqrt %41 : vector<8x1xf32>
      %43 = vector.broadcast %42 : vector<8x1xf32> to vector<8x32xf32>
      %44 = arith.mulf %39, %43 : vector<8x32xf32>
      %45 = vector.broadcast %25 : vector<1x32xf32> to vector<8x32xf32>
      %46 = arith.mulf %44, %45 : vector<8x32xf32>
      %47 = vector.broadcast %26 : vector<1x32xf32> to vector<8x32xf32>
      %48 = arith.addf %46, %47 : vector<8x32xf32>
      %c0_31 = arith.constant 0 : index
      %c0_32 = arith.constant 0 : index
      %49 = vector.load %arg19[%c0_31, %c0_32] : memref<8x32xf32, #tpu.memory_space<vmem>>, vector<8x32xf32>
      tpu.vector_store %arg19[%c0_31, %c0_32], %48 {strides = array<i32>} : memref<8x32xf32, #tpu.memory_space<vmem>>, vector<8x32xf32>,
    } else {
    }
    return
  }
  func.func @transform_0(%arg0: i32, %arg1: i32) -> (i32, i32) {
    %c0_i32 = arith.constant 0 : i32
    %c0_i32_0 = arith.constant 0 : i32
    return %arg0, %c0_i32 : i32, i32
  }
  func.func @transform_1(%arg0: i32, %arg1: i32) -> (i32, i32) {
    %c0_i32 = arith.constant 0 : i32
    %c0_i32_0 = arith.constant 0 : i32
    %c0_i32_1 = arith.constant 0 : i32
    return %c0_i32, %c0_i32_0 : i32, i32
  }
  func.func @transform_2(%arg0: i32, %arg1: i32) -> (i32, i32) {
    %c0_i32 = arith.constant 0 : i32
    %c0_i32_0 = arith.constant 0 : i32
    %c0_i32_1 = arith.constant 0 : i32
    return %c0_i32, %c0_i32_0 : i32, i32
  }
  func.func @transform_3(%arg0: i32, %arg1: i32) -> (i32, i32) {
    %c0_i32 = arith.constant 0 : i32
    %c0_i32_0 = arith.constant 0 : i32
    %c0_i32_1 = arith.constant 0 : i32
    return %c0_i32, %c0_i32_0 : i32, i32
  }
  func.func @transform_4(%arg0: i32, %arg1: i32) -> (i32, i32) {
    %c0_i32 = arith.constant 0 : i32
    %c0_i32_0 = arith.constant 0 : i32
    %c0_i32_1 = arith.constant 0 : i32
    return %c0_i32, %c0_i32_0 : i32, i32
  }
  func.func @transform_5(%arg0: i32, %arg1: i32) -> (i32, i32) {
    %c0_i32 = arith.constant 0 : i32
    %c0_i32_0 = arith.constant 0 : i32
    %c0_i32_1 = arith.constant 0 : i32
    return %c0_i32, %c0_i32_0 : i32, i32
  }
  func.func @transform_6(%arg0: i32, %arg1: i32) -> (i32, i32) {
    %c0_i32 = arith.constant 0 : i32
    %c0_i32_0 = arith.constant 0 : i32
    %c0_i32_1 = arith.constant 0 : i32
    return %c0_i32, %c0_i32_0 : i32, i32
  }
  func.func @transform_7(%arg0: i32, %arg1: i32) -> (i32, i32) {
    %c0_i32 = arith.constant 0 : i32
    %c0_i32_0 = arith.constant 0 : i32
    %c0_i32_1 = arith.constant 0 : i32
    return %c0_i32, %c0_i32_0 : i32, i32
  }
  func.func @transform_8(%arg0: i32, %arg1: i32) -> (i32, i32) {
    %c0_i32 = arith.constant 0 : i32
    %c0_i32_0 = arith.constant 0 : i32
    %c0_i32_1 = arith.constant 0 : i32
    return %c0_i32, %c0_i32_0 : i32, i32
  }
  func.func @transform_9(%arg0: i32, %arg1: i32) -> (i32, i32) {
    %c0_i32 = arith.constant 0 : i32
    %c0_i32_0 = arith.constant 0 : i32
    %c0_i32_1 = arith.constant 0 : i32
    return %c0_i32, %c0_i32_0 : i32, i32
  }
  func.func @transform_10(%arg0: i32, %arg1: i32) -> (i32, i32) {
    %c0_i32 = arith.constant 0 : i32
    %c0_i32_0 = arith.constant 0 : i32
    %c0_i32_1 = arith.constant 0 : i32
    return %c0_i32, %c0_i32_0 : i32, i32
  }
  func.func @transform_11(%arg0: i32, %arg1: i32) -> (i32, i32) {
    %c0_i32 = arith.constant 0 : i32
    %c0_i32_0 = arith.constant 0 : i32
    return %c0_i32, %arg1 : i32, i32
  }
  func.func @transform_12(%arg0: i32, %arg1: i32) -> (i32, i32) {
    %c0_i32 = arith.constant 0 : i32
    %c0_i32_0 = arith.constant 0 : i32
    return %c0_i32, %arg1 : i32, i32
  }
  func.func @transform_13(%arg0: i32, %arg1: i32) -> (i32, i32) {
    %c0_i32 = arith.constant 0 : i32
    %c0_i32_0 = arith.constant 0 : i32
    return %arg1, %c0_i32 : i32, i32
  }
  func.func @transform_14(%arg0: i32, %arg1: i32) -> (i32, i32) {
    %c0_i32 = arith.constant 0 : i32
    %c0_i32_0 = arith.constant 0 : i32
    %c0_i32_1 = arith.constant 0 : i32
    return %c0_i32, %c0_i32_0 : i32, i32
  }
  func.func @transform_15(%arg0: i32, %arg1: i32) -> (i32, i32) {
    %c0_i32 = arith.constant 0 : i32
    %c0_i32_0 = arith.constant 0 : i32
    %c0_i32_1 = arith.constant 0 : i32
    return %c0_i32, %c0_i32_0 : i32, i32
  }
  func.func @transform_16(%arg0: i32, %arg1: i32) -> (i32, i32) {
    %c0_i32 = arith.constant 0 : i32
    %c0_i32_0 = arith.constant 0 : i32
    %c0_i32_1 = arith.constant 0 : i32
    return %c0_i32, %c0_i32_0 : i32, i32
  }
  func.func @transform_17(%arg0: i32, %arg1: i32) -> (i32, i32) {
    %c0_i32 = arith.constant 0 : i32
    %c0_i32_0 = arith.constant 0 : i32
    return %arg0, %c0_i32 : i32, i32
  }
}

module attributes {stable_mosaic.version = 11 : i64} {
  func.func @kernel(%arg0: i32, %arg1: i32, %arg2: memref<8x32xf32, #tpu.memory_space<vmem>>, %arg3: memref<32x32xf32, #tpu.memory_space<vmem>>, %arg4: memref<1x32xf32, #tpu.memory_space<vmem>>, %arg5: memref<32x32xf32, #tpu.memory_space<vmem>>, %arg6: memref<1x32xf32, #tpu.memory_space<vmem>>, %arg7: memref<32x32xf32, #tpu.memory_space<vmem>>, %arg8: memref<1x32xf32, #tpu.memory_space<vmem>>, %arg9: memref<32x32xf32, #tpu.memory_space<vmem>>, %arg10: memref<1x32xf32, #tpu.memory_space<vmem>>, %arg11: memref<1x32xf32, #tpu.memory_space<vmem>>, %arg12: memref<1x32xf32, #tpu.memory_space<vmem>>, %arg13: memref<32x64xf32, #tpu.memory_space<vmem>>, %arg14: memref<1x64xf32, #tpu.memory_space<vmem>>, %arg15: memref<64x32xf32, #tpu.memory_space<vmem>>, %arg16: memref<1x32xf32, #tpu.memory_space<vmem>>, %arg17: memref<1x32xf32, #tpu.memory_space<vmem>>, %arg18: memref<1x32xf32, #tpu.memory_space<vmem>>, %arg19: memref<8x32xf32, #tpu.memory_space<vmem>>, %arg20: memref<8x32xf32, #tpu.memory_space<vmem>>, %arg21: memref<8x32xf32, #tpu.memory_space<vmem>>) attributes {dimension_semantics = [#tpu.dimension_semantics<parallel>, #tpu.dimension_semantics<arbitrary>], iteration_bounds = array<i64: 2, 1>, scalar_prefetch = 0 : i64, scratch_operands = 2 : i64, tpu.core_type = #tpu.core_type<tc>, window_params = [{transform_indices = @transform_0, window_bounds = array<i64: 8, 32>}, {pipeline_mode = #tpu.pipeline_mode<synchronous>, transform_indices = @transform_1, window_bounds = array<i64: 32, 32>}, {pipeline_mode = #tpu.pipeline_mode<synchronous>, transform_indices = @transform_2, window_bounds = array<i64: 1, 32>}, {pipeline_mode = #tpu.pipeline_mode<synchronous>, transform_indices = @transform_3, window_bounds = array<i64: 32, 32>}, {pipeline_mode = #tpu.pipeline_mode<synchronous>, transform_indices = @transform_4, window_bounds = array<i64: 1, 32>}, {pipeline_mode = #tpu.pipeline_mode<synchronous>, transform_indices = @transform_5, window_bounds = array<i64: 32, 32>}, {pipeline_mode = #tpu.pipeline_mode<synchronous>, transform_indices = @transform_6, window_bounds = array<i64: 1, 32>}, {pipeline_mode = #tpu.pipeline_mode<synchronous>, transform_indices = @transform_7, window_bounds = array<i64: 32, 32>}, {pipeline_mode = #tpu.pipeline_mode<synchronous>, transform_indices = @transform_8, window_bounds = array<i64: 1, 32>}, {pipeline_mode = #tpu.pipeline_mode<synchronous>, transform_indices = @transform_9, window_bounds = array<i64: 1, 32>}, {pipeline_mode = #tpu.pipeline_mode<synchronous>, transform_indices = @transform_10, window_bounds = array<i64: 1, 32>}, {transform_indices = @transform_11, window_bounds = array<i64: 32, 64>}, {transform_indices = @transform_12, window_bounds = array<i64: 1, 64>}, {transform_indices = @transform_13, window_bounds = array<i64: 64, 32>}, {pipeline_mode = #tpu.pipeline_mode<synchronous>, transform_indices = @transform_14, window_bounds = array<i64: 1, 32>}, {pipeline_mode = #tpu.pipeline_mode<synchronous>, transform_indices = @transform_15, window_bounds = array<i64: 1, 32>}, {pipeline_mode = #tpu.pipeline_mode<synchronous>, transform_indices = @transform_16, window_bounds = array<i64: 1, 32>}, {transform_indices = @transform_17, window_bounds = array<i64: 8, 32>}]} {
    %c0_i32 = arith.constant 0 : i32
    %0 = arith.cmpi eq, %arg1, %c0_i32 : i32
    %1 = arith.extui %0 : i1 to i32
    %c0_i32_0 = arith.constant 0 : i32
    %2 = arith.cmpi ne, %1, %c0_i32_0 : i32
    scf.if %2 {
      %c0_16 = arith.constant 0 : index
      %c0_17 = arith.constant 0 : index
      %19 = vector.load %arg2[%c0_16, %c0_17] : memref<8x32xf32, #tpu.memory_space<vmem>>, vector<8x32xf32>
      %c0_18 = arith.constant 0 : index
      %c0_19 = arith.constant 0 : index
      %20 = vector.load %arg3[%c0_18, %c0_19] : memref<32x32xf32, #tpu.memory_space<vmem>>, vector<32x32xf32>
      %cst_20 = arith.constant dense<0.000000e+00> : vector<8x32xf32>
      %21 = tpu.matmul %19, %20, %cst_20 {dimension_numbers = #tpu.dot_dimension_numbers<[1], [0], [0], [1], [0, 0, 1, 1], [], []>} : vector<8x32xf32>, vector<32x32xf32>, vector<8x32xf32> -> vector<8x32xf32>
      %c0_21 = arith.constant 0 : index
      %c0_22 = arith.constant 0 : index
      %22 = vector.load %arg4[%c0_21, %c0_22] : memref<1x32xf32, #tpu.memory_space<vmem>>, vector<1x32xf32>
      %23 = vector.broadcast %22 : vector<1x32xf32> to vector<8x32xf32>
      %24 = arith.addf %21, %23 : vector<8x32xf32>
      %c0_23 = arith.constant 0 : index
      %c0_24 = arith.constant 0 : index
      %25 = vector.load %arg5[%c0_23, %c0_24] : memref<32x32xf32, #tpu.memory_space<vmem>>, vector<32x32xf32>
      %cst_25 = arith.constant dense<0.000000e+00> : vector<8x32xf32>
      %26 = tpu.matmul %19, %25, %cst_25 {dimension_numbers = #tpu.dot_dimension_numbers<[1], [0], [0], [1], [0, 0, 1, 1], [], []>} : vector<8x32xf32>, vector<32x32xf32>, vector<8x32xf32> -> vector<8x32xf32>
      %c0_26 = arith.constant 0 : index
      %c0_27 = arith.constant 0 : index
      %27 = vector.load %arg6[%c0_26, %c0_27] : memref<1x32xf32, #tpu.memory_space<vmem>>, vector<1x32xf32>
      %28 = vector.broadcast %27 : vector<1x32xf32> to vector<8x32xf32>
      %29 = arith.addf %26, %28 : vector<8x32xf32>
      %c0_28 = arith.constant 0 : index
      %c0_29 = arith.constant 0 : index
      %30 = vector.load %arg7[%c0_28, %c0_29] : memref<32x32xf32, #tpu.memory_space<vmem>>, vector<32x32xf32>
      %cst_30 = arith.constant dense<0.000000e+00> : vector<8x32xf32>
      %31 = tpu.matmul %19, %30, %cst_30 {dimension_numbers = #tpu.dot_dimension_numbers<[1], [0], [0], [1], [0, 0, 1, 1], [], []>} : vector<8x32xf32>, vector<32x32xf32>, vector<8x32xf32> -> vector<8x32xf32>
      %c0_31 = arith.constant 0 : index
      %c0_32 = arith.constant 0 : index
      %32 = vector.load %arg8[%c0_31, %c0_32] : memref<1x32xf32, #tpu.memory_space<vmem>>, vector<1x32xf32>
      %33 = vector.broadcast %32 : vector<1x32xf32> to vector<8x32xf32>
      %34 = arith.addf %31, %33 : vector<8x32xf32>
      %35 = tpu.transpose %24, [1, 0] : vector<8x32xf32> -> vector<32x8xf32>
      %36 = vector.shape_cast %35 : vector<32x8xf32> to vector<4x8x8xf32>
      %37 = tpu.transpose %36, [0, 2, 1] : vector<4x8x8xf32> -> vector<4x8x8xf32>
      %38 = tpu.transpose %29, [1, 0] : vector<8x32xf32> -> vector<32x8xf32>
      %39 = vector.shape_cast %38 : vector<32x8xf32> to vector<4x8x8xf32>
      %40 = tpu.transpose %39, [0, 2, 1] : vector<4x8x8xf32> -> vector<4x8x8xf32>
      %41 = tpu.transpose %34, [1, 0] : vector<8x32xf32> -> vector<32x8xf32>
      %42 = vector.shape_cast %41 : vector<32x8xf32> to vector<4x8x8xf32>
      %43 = tpu.transpose %42, [0, 2, 1] : vector<4x8x8xf32> -> vector<4x8x8xf32>
      "tpu.trace_start"() <{level = 10 : i32, message = "bqd,bkd->bqk"}> : () -> ()
      %cst_33 = arith.constant dense<0.000000e+00> : vector<4x8x8xf32>
      %44 = tpu.matmul %37, %40, %cst_33 {dimension_numbers = #tpu.dot_dimension_numbers<[2], [2], [1], [1], [0, 0, 0, 1, 1, 1], [0], [0]>} : vector<4x8x8xf32>, vector<4x8x8xf32>, vector<4x8x8xf32> -> vector<4x8x8xf32>
      "tpu.trace_stop"() : () -> ()
      %cst_34 = arith.constant dense<0xFF800000> : vector<4x8xf32>
      %45 = vector.multi_reduction <maximumf>, %44, %cst_34 [2] : vector<4x8x8xf32> to vector<4x8xf32>
      %46 = vector.shape_cast %45 : vector<4x8xf32> to vector<4x8x1xf32>
      %47 = vector.broadcast %46 : vector<4x8x1xf32> to vector<4x8x8xf32>
      %48 = arith.subf %44, %47 : vector<4x8x8xf32>
      %49 = math.exp %48 : vector<4x8x8xf32>
      %cst_35 = arith.constant dense<0.000000e+00> : vector<4x8xf32>
      %50 = vector.multi_reduction <add>, %49, %cst_35 [2] : vector<4x8x8xf32> to vector<4x8xf32>
      %51 = vector.shape_cast %50 : vector<4x8xf32> to vector<4x8x1xf32>
      "tpu.trace_start"() <{level = 10 : i32, message = "bqk,bkd->bqd"}> : () -> ()
      %cst_36 = arith.constant dense<0.000000e+00> : vector<4x8x8xf32>
      %52 = tpu.matmul %49, %43, %cst_36 {dimension_numbers = #tpu.dot_dimension_numbers<[2], [1], [1], [2], [0, 0, 0, 1, 1, 2], [0], [0]>} : vector<4x8x8xf32>, vector<4x8x8xf32>, vector<4x8x8xf32> -> vector<4x8x8xf32>
      "tpu.trace_stop"() : () -> ()
      %53 = vector.broadcast %51 : vector<4x8x1xf32> to vector<4x8x8xf32>
      %54 = arith.divf %52, %53 : vector<4x8x8xf32>
      %55 = tpu.transpose %54, [0, 2, 1] : vector<4x8x8xf32> -> vector<4x8x8xf32>
      %56 = vector.shape_cast %55 : vector<4x8x8xf32> to vector<32x8xf32>
      %57 = tpu.transpose %56, [1, 0] : vector<32x8xf32> -> vector<8x32xf32>
      %c0_37 = arith.constant 0 : index
      %c0_38 = arith.constant 0 : index
      %58 = vector.load %arg9[%c0_37, %c0_38] : memref<32x32xf32, #tpu.memory_space<vmem>>, vector<32x32xf32>
      %cst_39 = arith.constant dense<0.000000e+00> : vector<8x32xf32>
      %59 = tpu.matmul %57, %58, %cst_39 {dimension_numbers = #tpu.dot_dimension_numbers<[1], [0], [0], [1], [0, 0, 1, 1], [], []>} : vector<8x32xf32>, vector<32x32xf32>, vector<8x32xf32> -> vector<8x32xf32>
      %c0_40 = arith.constant 0 : index
      %c0_41 = arith.constant 0 : index
      %60 = vector.load %arg10[%c0_40, %c0_41] : memref<1x32xf32, #tpu.memory_space<vmem>>, vector<1x32xf32>
      %61 = vector.broadcast %60 : vector<1x32xf32> to vector<8x32xf32>
      %62 = arith.addf %59, %61 : vector<8x32xf32>
      %63 = arith.addf %19, %62 : vector<8x32xf32>
      %c0_42 = arith.constant 0 : index
      %c0_43 = arith.constant 0 : index
      %64 = vector.load %arg11[%c0_42, %c0_43] : memref<1x32xf32, #tpu.memory_space<vmem>>, vector<1x32xf32>
      %c0_44 = arith.constant 0 : index
      %c0_45 = arith.constant 0 : index
      %65 = vector.load %arg12[%c0_44, %c0_45] : memref<1x32xf32, #tpu.memory_space<vmem>>, vector<1x32xf32>
      %cst_46 = arith.constant dense<0.000000e+00> : vector<8xf32>
      %66 = vector.multi_reduction <add>, %63, %cst_46 [1] : vector<8x32xf32> to vector<8xf32>
      %67 = vector.shape_cast %66 : vector<8xf32> to vector<8x1xf32>
      %cst_47 = arith.constant 3.200000e+01 : f32
      %68 = vector.broadcast %cst_47 : f32 to vector<8x1xf32>
      %69 = arith.divf %67, %68 : vector<8x1xf32>
      %70 = vector.broadcast %69 : vector<8x1xf32> to vector<8x32xf32>
      %71 = arith.subf %63, %70 : vector<8x32xf32>
      %72 = arith.mulf %71, %71 : vector<8x32xf32>
      %cst_48 = arith.constant dense<0.000000e+00> : vector<8xf32>
      %73 = vector.multi_reduction <add>, %72, %cst_48 [1] : vector<8x32xf32> to vector<8xf32>
      %74 = vector.shape_cast %73 : vector<8xf32> to vector<8x1xf32>
      %cst_49 = arith.constant 3.200000e+01 : f32
      %75 = vector.broadcast %cst_49 : f32 to vector<8x1xf32>
      %76 = arith.divf %74, %75 : vector<8x1xf32>
      %77 = vector.broadcast %69 : vector<8x1xf32> to vector<8x32xf32>
      %78 = arith.subf %63, %77 : vector<8x32xf32>
      %cst_50 = arith.constant 9.99999974E-6 : f32
      %79 = vector.broadcast %cst_50 : f32 to vector<8x1xf32>
      %80 = arith.addf %76, %79 : vector<8x1xf32>
      %81 = math.rsqrt %80 : vector<8x1xf32>
      %82 = vector.broadcast %81 : vector<8x1xf32> to vector<8x32xf32>
      %83 = arith.mulf %78, %82 : vector<8x32xf32>
      %84 = vector.broadcast %64 : vector<1x32xf32> to vector<8x32xf32>
      %85 = arith.mulf %83, %84 : vector<8x32xf32>
      %86 = vector.broadcast %65 : vector<1x32xf32> to vector<8x32xf32>
      %87 = arith.addf %85, %86 : vector<8x32xf32>
      %c0_51 = arith.constant 0 : index
      %c0_52 = arith.constant 0 : index
      %88 = vector.load %arg20[%c0_51, %c0_52] : memref<8x32xf32, #tpu.memory_space<vmem>>, vector<8x32xf32>
      tpu.vector_store %arg20[%c0_51, %c0_52], %87 {strides = array<i32>} : memref<8x32xf32, #tpu.memory_space<vmem>>, vector<8x32xf32>,
      %cst_53 = arith.constant 0.000000e+00 : f32
      %89 = vector.broadcast %cst_53 : f32 to vector<8x32xf32>
      %c0_54 = arith.constant 0 : index
      %c0_55 = arith.constant 0 : index
      %90 = vector.load %arg21[%c0_54, %c0_55] : memref<8x32xf32, #tpu.memory_space<vmem>>, vector<8x32xf32>
      tpu.vector_store %arg21[%c0_54, %c0_55], %89 {strides = array<i32>} : memref<8x32xf32, #tpu.memory_space<vmem>>, vector<8x32xf32>,
    } else {
    }
    %c0 = arith.constant 0 : index
    %c0_1 = arith.constant 0 : index
    %3 = vector.load %arg20[%c0, %c0_1] : memref<8x32xf32, #tpu.memory_space<vmem>>, vector<8x32xf32>
    %c0_2 = arith.constant 0 : index
    %c0_3 = arith.constant 0 : index
    %4 = vector.load %arg13[%c0_2, %c0_3] : memref<32x64xf32, #tpu.memory_space<vmem>>, vector<32x64xf32>
    %cst = arith.constant dense<0.000000e+00> : vector<8x64xf32>
    %5 = tpu.matmul %3, %4, %cst {dimension_numbers = #tpu.dot_dimension_numbers<[1], [0], [0], [1], [0, 0, 1, 1], [], []>} : vector<8x32xf32>, vector<32x64xf32>, vector<8x64xf32> -> vector<8x64xf32>
    %c0_4 = arith.constant 0 : index
    %c0_5 = arith.constant 0 : index
    %6 = vector.load %arg14[%c0_4, %c0_5] : memref<1x64xf32, #tpu.memory_space<vmem>>, vector<1x64xf32>
    %7 = vector.broadcast %6 : vector<1x64xf32> to vector<8x64xf32>
    %8 = arith.addf %5, %7 : vector<8x64xf32>
    %cst_6 = arith.constant 0.000000e+00 : f32
    %9 = vector.broadcast %cst_6 : f32 to vector<8x64xf32>
    %10 = arith.maximumf %8, %9 : vector<8x64xf32>
    %c0_7 = arith.constant 0 : index
    %c0_8 = arith.constant 0 : index
    %11 = vector.load %arg21[%c0_7, %c0_8] : memref<8x32xf32, #tpu.memory_space<vmem>>, vector<8x32xf32>
    %c0_9 = arith.constant 0 : index
    %c0_10 = arith.constant 0 : index
    %12 = vector.load %arg15[%c0_9, %c0_10] : memref<64x32xf32, #tpu.memory_space<vmem>>, vector<64x32xf32>
    %cst_11 = arith.constant dense<0.000000e+00> : vector<8x32xf32>
    %13 = tpu.matmul %10, %12, %cst_11 {dimension_numbers = #tpu.dot_dimension_numbers<[1], [0], [0], [1], [0, 0, 1, 1], [], []>} : vector<8x64xf32>, vector<64x32xf32>, vector<8x32xf32> -> vector<8x32xf32>
    %14 = arith.addf %11, %13 : vector<8x32xf32>
    %c0_12 = arith.constant 0 : index
    %c0_13 = arith.constant 0 : index
    %15 = vector.load %arg21[%c0_12, %c0_13] : memref<8x32xf32, #tpu.memory_space<vmem>>, vector<8x32xf32>
    tpu.vector_store %arg21[%c0_12, %c0_13], %14 {strides = array<i32>} : memref<8x32xf32, #tpu.memory_space<vmem>>, vector<8x32xf32>,
    %c0_i32_14 = arith.constant 0 : i32
    %16 = arith.cmpi eq, %arg1, %c0_i32_14 : i32
    %17 = arith.extui %16 : i1 to i32
    %c0_i32_15 = arith.constant 0 : i32
    %18 = arith.cmpi ne, %17, %c0_i32_15 : i32
    scf.if %18 {
      %c0_16 = arith.constant 0 : index
      %c0_17 = arith.constant 0 : index
      %19 = vector.load %arg21[%c0_16, %c0_17] : memref<8x32xf32, #tpu.memory_space<vmem>>, vector<8x32xf32>
      %c0_18 = arith.constant 0 : index
      %c0_19 = arith.constant 0 : index
      %20 = vector.load %arg16[%c0_18, %c0_19] : memref<1x32xf32, #tpu.memory_space<vmem>>, vector<1x32xf32>
      %21 = vector.broadcast %20 : vector<1x32xf32> to vector<8x32xf32>
      %22 = arith.addf %19, %21 : vector<8x32xf32>
      %c0_20 = arith.constant 0 : index
      %c0_21 = arith.constant 0 : index
      %23 = vector.load %arg20[%c0_20, %c0_21] : memref<8x32xf32, #tpu.memory_space<vmem>>, vector<8x32xf32>
      %24 = arith.addf %23, %22 : vector<8x32xf32>
      %c0_22 = arith.constant 0 : index
      %c0_23 = arith.constant 0 : index
      %25 = vector.load %arg17[%c0_22, %c0_23] : memref<1x32xf32, #tpu.memory_space<vmem>>, vector<1x32xf32>
      %c0_24 = arith.constant 0 : index
      %c0_25 = arith.constant 0 : index
      %26 = vector.load %arg18[%c0_24, %c0_25] : memref<1x32xf32, #tpu.memory_space<vmem>>, vector<1x32xf32>
      %cst_26 = arith.constant dense<0.000000e+00> : vector<8xf32>
      %27 = vector.multi_reduction <add>, %24, %cst_26 [1] : vector<8x32xf32> to vector<8xf32>
      %28 = vector.shape_cast %27 : vector<8xf32> to vector<8x1xf32>
      %cst_27 = arith.constant 3.200000e+01 : f32
      %29 = vector.broadcast %cst_27 : f32 to vector<8x1xf32>
      %30 = arith.divf %28, %29 : vector<8x1xf32>
      %31 = vector.broadcast %30 : vector<8x1xf32> to vector<8x32xf32>
      %32 = arith.subf %24, %31 : vector<8x32xf32>
      %33 = arith.mulf %32, %32 : vector<8x32xf32>
      %cst_28 = arith.constant dense<0.000000e+00> : vector<8xf32>
      %34 = vector.multi_reduction <add>, %33, %cst_28 [1] : vector<8x32xf32> to vector<8xf32>
      %35 = vector.shape_cast %34 : vector<8xf32> to vector<8x1xf32>
      %cst_29 = arith.constant 3.200000e+01 : f32
      %36 = vector.broadcast %cst_29 : f32 to vector<8x1xf32>
      %37 = arith.divf %35, %36 : vector<8x1xf32>
      %38 = vector.broadcast %30 : vector<8x1xf32> to vector<8x32xf32>
      %39 = arith.subf %24, %38 : vector<8x32xf32>
      %cst_30 = arith.constant 9.99999974E-6 : f32
      %40 = vector.broadcast %cst_30 : f32 to vector<8x1xf32>
      %41 = arith.addf %37, %40 : vector<8x1xf32>
      %42 = math.rsqrt %41 : vector<8x1xf32>
      %43 = vector.broadcast %42 : vector<8x1xf32> to vector<8x32xf32>
      %44 = arith.mulf %39, %43 : vector<8x32xf32>
      %45 = vector.broadcast %25 : vector<1x32xf32> to vector<8x32xf32>
      %46 = arith.mulf %44, %45 : vector<8x32xf32>
      %47 = vector.broadcast %26 : vector<1x32xf32> to vector<8x32xf32>
      %48 = arith.addf %46, %47 : vector<8x32xf32>
      %c0_31 = arith.constant 0 : index
      %c0_32 = arith.constant 0 : index
      %49 = vector.load %arg19[%c0_31, %c0_32] : memref<8x32xf32, #tpu.memory_space<vmem>>, vector<8x32xf32>
      tpu.vector_store %arg19[%c0_31, %c0_32], %48 {strides = array<i32>} : memref<8x32xf32, #tpu.memory_space<vmem>>, vector<8x32xf32>,
    } else {
    }
    return
  }
  func.func @transform_0(%arg0: i32, %arg1: i32) -> (i32, i32) {
    %c0_i32 = arith.constant 0 : i32
    %c0_i32_0 = arith.constant 0 : i32
    return %arg0, %c0_i32 : i32, i32
  }
  func.func @transform_1(%arg0: i32, %arg1: i32) -> (i32, i32) {
    %c0_i32 = arith.constant 0 : i32
    %c0_i32_0 = arith.constant 0 : i32
    %c0_i32_1 = arith.constant 0 : i32
    return %c0_i32, %c0_i32_0 : i32, i32
  }
  func.func @transform_2(%arg0: i32, %arg1: i32) -> (i32, i32) {
    %c0_i32 = arith.constant 0 : i32
    %c0_i32_0 = arith.constant 0 : i32
    %c0_i32_1 = arith.constant 0 : i32
    return %c0_i32, %c0_i32_0 : i32, i32
  }
  func.func @transform_3(%arg0: i32, %arg1: i32) -> (i32, i32) {
    %c0_i32 = arith.constant 0 : i32
    %c0_i32_0 = arith.constant 0 : i32
    %c0_i32_1 = arith.constant 0 : i32
    return %c0_i32, %c0_i32_0 : i32, i32
  }
  func.func @transform_4(%arg0: i32, %arg1: i32) -> (i32, i32) {
    %c0_i32 = arith.constant 0 : i32
    %c0_i32_0 = arith.constant 0 : i32
    %c0_i32_1 = arith.constant 0 : i32
    return %c0_i32, %c0_i32_0 : i32, i32
  }
  func.func @transform_5(%arg0: i32, %arg1: i32) -> (i32, i32) {
    %c0_i32 = arith.constant 0 : i32
    %c0_i32_0 = arith.constant 0 : i32
    %c0_i32_1 = arith.constant 0 : i32
    return %c0_i32, %c0_i32_0 : i32, i32
  }
  func.func @transform_6(%arg0: i32, %arg1: i32) -> (i32, i32) {
    %c0_i32 = arith.constant 0 : i32
    %c0_i32_0 = arith.constant 0 : i32
    %c0_i32_1 = arith.constant 0 : i32
    return %c0_i32, %c0_i32_0 : i32, i32
  }
  func.func @transform_7(%arg0: i32, %arg1: i32) -> (i32, i32) {
    %c0_i32 = arith.constant 0 : i32
    %c0_i32_0 = arith.constant 0 : i32
    %c0_i32_1 = arith.constant 0 : i32
    return %c0_i32, %c0_i32_0 : i32, i32
  }
  func.func @transform_8(%arg0: i32, %arg1: i32) -> (i32, i32) {
    %c0_i32 = arith.constant 0 : i32
    %c0_i32_0 = arith.constant 0 : i32
    %c0_i32_1 = arith.constant 0 : i32
    return %c0_i32, %c0_i32_0 : i32, i32
  }
  func.func @transform_9(%arg0: i32, %arg1: i32) -> (i32, i32) {
    %c0_i32 = arith.constant 0 : i32
    %c0_i32_0 = arith.constant 0 : i32
    %c0_i32_1 = arith.constant 0 : i32
    return %c0_i32, %c0_i32_0 : i32, i32
  }
  func.func @transform_10(%arg0: i32, %arg1: i32) -> (i32, i32) {
    %c0_i32 = arith.constant 0 : i32
    %c0_i32_0 = arith.constant 0 : i32
    %c0_i32_1 = arith.constant 0 : i32
    return %c0_i32, %c0_i32_0 : i32, i32
  }
  func.func @transform_11(%arg0: i32, %arg1: i32) -> (i32, i32) {
    %c0_i32 = arith.constant 0 : i32
    %c0_i32_0 = arith.constant 0 : i32
    return %c0_i32, %arg1 : i32, i32
  }
  func.func @transform_12(%arg0: i32, %arg1: i32) -> (i32, i32) {
    %c0_i32 = arith.constant 0 : i32
    %c0_i32_0 = arith.constant 0 : i32
    return %c0_i32, %arg1 : i32, i32
  }
  func.func @transform_13(%arg0: i32, %arg1: i32) -> (i32, i32) {
    %c0_i32 = arith.constant 0 : i32
    %c0_i32_0 = arith.constant 0 : i32
    return %arg1, %c0_i32 : i32, i32
  }
  func.func @transform_14(%arg0: i32, %arg1: i32) -> (i32, i32) {
    %c0_i32 = arith.constant 0 : i32
    %c0_i32_0 = arith.constant 0 : i32
    %c0_i32_1 = arith.constant 0 : i32
    return %c0_i32, %c0_i32_0 : i32, i32
  }
  func.func @transform_15(%arg0: i32, %arg1: i32) -> (i32, i32) {
    %c0_i32 = arith.constant 0 : i32
    %c0_i32_0 = arith.constant 0 : i32
    %c0_i32_1 = arith.constant 0 : i32
    return %c0_i32, %c0_i32_0 : i32, i32
  }
  func.func @transform_16(%arg0: i32, %arg1: i32) -> (i32, i32) {
    %c0_i32 = arith.constant 0 : i32
    %c0_i32_0 = arith.constant 0 : i32
    %c0_i32_1 = arith.constant 0 : i32
    return %c0_i32, %c0_i32_0 : i32, i32
  }
  func.func @transform_17(%arg0: i32, %arg1: i32) -> (i32, i32) {
    %c0_i32 = arith.constant 0 : i32
    %c0_i32_0 = arith.constant 0 : i32
    return %arg0, %c0_i32 : i32, i32
  }
}

</mosaic_0001>

<bundles_post_ra>
// kernel: tpu_custom_call.1
= control target key start
LH: loop header
LB: loop body
LE: loop exit
PB: predicated region body
PF: predicated region fallthrough
CT: control target
= control target key end

     0   :  { %s3353_s0 = inlined_call_operand.hbm [shape: f32[16,32], index: 0, kind: input, shape index: {}]   ;;  %s3354_s1 = inlined_call_operand.vmem [shape: f32[32,32], index: 1, kind: input, shape index: {}]   ;;  %s3355_s2 = inlined_call_operand.vmem [shape: f32[1,32], index: 2, kind: input, shape index: {}]   ;;  %s3356_s3 = inlined_call_operand.vmem [shape: f32[32,32], index: 3, kind: input, shape index: {}]   ;;  %s3357_s4 = inlined_call_operand.vmem [shape: f32[1,32], index: 4, kind: input, shape index: {}]   ;;  %s3358_s5 = inlined_call_operand.vmem [shape: f32[32,32], index: 5, kind: input, shape index: {}]   ;;  %s3359_s6 = inlined_call_operand.vmem [shape: f32[1,32], index: 6, kind: input, shape index: {}]   ;;  %s3360_s7 = inlined_call_operand.hbm [shape: f32[32,32], index: 7, kind: input, shape index: {}]   ;;  %s3361_s8 = inlined_call_operand.vmem [shape: f32[1,32], index: 8, kind: input, shape index: {}]   ;;  %s3362_s9 = inlined_call_operand.vmem [shape: f32[1,32], index: 9, kind: input, shape index: {}]   ;;  %s3363_s10 = inlined_call_operand.vmem [shape: f32[1,32], index: 10, kind: input, shape index: {}]   ;;  %s3364_s11 = inlined_call_operand.hbm [shape: f32[32,64], index: 11, kind: input, shape index: {}]   ;;  %s3365_s12 = inlined_call_operand.vmem [shape: f32[1,64], index: 12, kind: input, shape index: {}]   ;;  %s3366_s13 = inlined_call_operand.vmem [shape: f32[64,32], index: 13, kind: input, shape index: {}]   ;;  %s3367_s14 = inlined_call_operand.vmem [shape: f32[1,32], index: 14, kind: input, shape index: {}]   ;;  %s3368_s15 = inlined_call_operand.vmem [shape: f32[1,32], index: 15, kind: input, shape index: {}]   ;;  %s3369_s16 = inlined_call_operand.vmem [shape: f32[1,32], index: 16, kind: input, shape index: {}]   ;;  %s3370_s17 = inlined_call_operand.hbm [shape: f32[16,32], index: 17, kind: output, shape index: {}]  }
   0x1   :  { %3380 = sst [smem:[#allocation19_spill]] %s3353_s0 }
   0x2   :  { %3381 = sst [smem:[#allocation20_spill]] %s3354_s1 }
   0x3   :  { %3382 = sst [smem:[#allocation21_spill]] %s3360_s7 }
   0x4   :  { %3383 = sst [smem:[#allocation22_spill]] %s3364_s11 }
   0x5   :  { %3384 = sst [smem:[#allocation23_spill]] %s3365_s12 }
   0x6   :  { %3385 = sst [smem:[#allocation24_spill]] %s3367_s14 }
   0x7   :  { %3386 = sst [smem:[#allocation25_spill]] %s3368_s15 }
   0x8   :  { %3387 = sst [smem:[#allocation26_spill]] %s3369_s16 }
   0x9   :  { %3388 = sst [smem:[#allocation27_spill]] %s3370_s17 }
   0xa   :  { %22 = vsyncpa [#allocation5], 0 }
   0xb   :  { %24 = vsyncpa [#allocation5 + $0x1], 0 }
   0xc   :  { %25 = vsyncpa [#allocation8], 0 }
   0xd   :  { %26 = vsyncpa [#allocation6], 0 }
   0xe   :  { %28 = vsyncpa [#allocation6 + $0x1], 0  ;;  %s2981_s24 = smov 0   ;;  %s2983_s25 = smov 0  }
   0xf   :  { %s2985_s26 = smov 0   ;;  %s2987_s27 = smov 0  }
  0x10   :  { %s2989_s28 = smov 0   ;;  %s2991_s29 = smov 0  }
  0x11 LB: > { %3389 = sst [smem:[#allocation14_spill]] %s2861_s24  ;;  %s2399_s0 = sadd.s32 4294967295, %s2881_s29   ;;  %s2881_s29 = sphi %s2991_s29, %s34_s29   ;;  %s2877_s28 = sphi %s2989_s28, %s3419_s28   ;;  %s2873_s27 = sphi %s2987_s27, %s3418_s27   ;;  %s2869_s26 = sphi %s2985_s26, %s3422_s26   ;;  %s2865_s25 = sphi %s2983_s25, %s3421_s25   ;;  %s2861_s24 = sphi %s2981_s24, %s3420_s24  }
  0x12   : > { %3390 = sst [smem:[#allocation15_spill]] %s2873_s27  ;;  %s2400_s30 = sadd.s32 4294967294, %s2881_s29  }
  0x13   : > { %3391 = sst [smem:[#allocation16_spill]] %s2877_s28  ;;  %p66_p0 = scmp.ne.s32.totalorder %s2865_s25, %s2861_s24 }
  0x14   : > { %p3015_p1 = scmp.eq.s32.totalorder %s2399_s0, 0  ;;  %p3019_p2 = scmp.eq.s32.totalorder %s2399_s0, 1 }
  0x15   : > { %p447_p3 = scmp.eq.s32.totalorder %s2400_s30, 1  ;;  %p2401_p5 = scmp.ge.s32.totalorder %s2881_s29, 1 }
  0x16   : > { %s3392_s18 = scalar_select %p3015_p1, 1, 0 }
  0x17   : > { %p3025_p4 = por %p3015_p1, %p66_p0  ;;  %p3030_p6 = por %p447_p3, %p66_p0 }
  0x18   : > { %p454_p7 = scmp.lt.s32.totalorder %s2881_s29, 3  ;;  %s2883_s22 = smov [#allocation7]  }
  0x19   : > { %s3394_s1 = scalar_select %p3025_p4, 1, 0 }
  0x1a   : > { %s3395_s20 = scalar_select %p3030_p6, 1, 0 }
  0x1b   : > { %p3035_p8 = pnand %p2401_p5, %p454_p7  ;;  %s484_s23 = sshll.u32 %s2883_s22, 4  ;;  %s485_s23 = int_to_ptr.vmem [resolvable:$true] %s484_s23 }
  0x1c   : > { %3396 = sst [smem:[#allocation17_spill]] %s3395_s20  ;;  %s2884_s30 = smov [#allocation9]  }
  0x1d   : > { %p2622_p9 = pneg %p3035_p8  ;;  %s508_s20 = sshll.u32 %s2884_s30, 4  ;;  %s509_s20 = int_to_ptr.vmem [resolvable:$true] %s508_s20 }
  0x1e   : > { %s2728_s24 = scalar_lea.vmem %s485_s23, 512  ;;  %p2736_p5 = scmp.lt.s32.totalorder %s485_s23, %s485_s23 }
  0x1f   : > { %p3044_p11 = pnand %p2622_p9, %p3015_p1  ;;  %p2729_p13 = scmp.ne.s32.totalorder %s485_s23, %s2728_s24 }
  0x20   : > { %p2737_p7 = scmp.lt.s32.totalorder %s2728_s24, %s2728_s24 }
  0x21   : > { %p2719_p12 = pneg %p3044_p11 }
  0x22   : > { %p2738_p10 = por %p2737_p7, %p2736_p5 }
  0x23   : > { %p2731_p0 = pnand %p2729_p13, %p2719_p12 }
  0x25   : > { %p2732_p3 = pneg %p2731_p0 }
  0x27   : > { %p2739_p9 = pnand %p2738_p10, %p2732_p3 }
  0x29   : > { %2742 = shalt.err (!%p2739_p9)
}
  0x2a   : > { %s2885_s22 = smov 128   ;;  %s2886_s17 = smov 8  }
  0x2b   : > { %s3399_s7 = sld [smem:[#allocation21_spill]]  ;;  %s2754_s15 = scalar_lea.vmem %s509_s20, 512 }
  0x2c   : > { %p2755_p6 = scmp.ne.s32.totalorder %s509_s20, %s2754_s15  ;;  %p2762_p1 = scmp.lt.s32.totalorder %s509_s20, %s509_s20 }
  0x2d   : > { %p2763_p4 = scmp.lt.s32.totalorder %s2754_s15, %s2754_s15 }
  0x2e   : > { %p2757_p13 = pnand %p2755_p6, %p2719_p12 }
  0x2f   : > { %p2764_p5 = por %p2763_p4, %p2762_p1 }
  0x30   : > { %p2758_p0 = pneg %p2757_p13 }
  0x31   : > { %2625 = dma.hbm_to_vmem [thread:$0]  (!%p3044_p11), %s3399_s7, 512, %s485_s23, [#allocation8], %s2885_s22, %s2885_s22, %s2886_s17  }
  0x32   : > { %p2765_p10 = pnand %p2764_p5, %p2758_p0 }
  0x34   : > { %2768 = shalt.err (!%p2765_p10)
}
  0x35   : > { %s3400_s11 = sld [smem:[#allocation22_spill]]  ;;  %s46_s15 = sadd.s32 1, %s2877_s28 }
  0x36   : > { %s53_s16 = sadd.s32 1, %s2869_s26  ;;  %p48_p1 = scmp.ge.s32.totalorder %s46_s15, 2 }
  0x37   : > { %p60_p4 = scmp.ne.s32.totalorder %s2869_s26, %s2865_s25  ;;  %p61_p6 = scmp.eq.s32.totalorder %s2881_s29, 0 }
  0x38   : > { %p2639_p12 = scmp.lt.s32.totalorder %s2881_s29, 2  ;;  %s3424_s15 = smov (%p48_p1, %s46_s15), 0 }
  0x39   : > { %3401 = sst [smem:[#allocation18_spill]] %s3424_s15  ;;  %p62_p3 = por %p61_p6, %p60_p4 }
  0x3a   : > { %p3076_p7 = por %p3019_p2, %p60_p4  ;;  %s50_s23 = ssub.s32 %s2877_s28, %s3424_s15 }
  0x3b   : > { %2628 = dma.hbm_to_vmem [thread:$0]  (!%p3044_p11), %s3400_s11, 512, %s509_s20, [#allocation8], %s2885_s22, %s2885_s22, %s2886_s17  }
  0x3c   : > { %s546_s0 = sand.u32 1, %s2869_s26   ;;  %p51_p9 = scmp.eq.s32.totalorder %s50_s23, 0 }
  0x3d   : > { %s2407_s17 = sshll.u32 %s546_s0, 3  ;;  %s2408_s20 = sshll.u32 %s2877_s28, 7 }
  0x3e   : > { %s3085_s22 = scalar_select %p51_p9, %s2869_s26, %s53_s16  }
  0x3f   : > { %s3403_s7 = sld [smem:[#allocation19_spill]]  ;;  %s550_s14 = scalar_lea.vmem [#allocation4], %s2407_s17 }
  0x40   : > { %s557_s12 = sshll.u32 %s550_s14, 4  ;;  %p3092_p11 = pnand %p2639_p12, %p62_p3  ;;  %s558_s12 = int_to_ptr.vmem [resolvable:$true] %s557_s12 }
  0x41   : > { %s547_s15 = scalar_lea.sflag [#allocation5], %s546_s0  ;;  %s2782_s23 = scalar_lea.vmem %s558_s12, 128 }
  0x42   : > { %p2771_p2 = pneg %p3092_p11  ;;  %p2783_p13 = scmp.ne.s32.totalorder %s558_s12, %s2782_s23 }
  0x43   : > { %s2887_s16 = smov [#allocation4]  }
  0x44   : > { %p2785_p0 = pnand %p2783_p13, %p2771_p2  ;;  %s2787_s28 = sshll.u32 %s2887_s16, 4  ;;  %s2788_s28 = int_to_ptr.vmem [resolvable:$false] %s2787_s28 }
  0x45   : > { %s555_s11 = scalar_lea.hbm %s3403_s7, %s2408_s20  ;;  %s2789_s7 = scalar_lea.vmem %s2788_s28, 256 }
  0x46   : > { %p2786_p5 = pneg %p2785_p0  ;;  %p2790_p10 = scmp.lt.s32.totalorder %s558_s12, %s2788_s28 }
  0x47   : > { %p2791_p1 = scmp.lt.s32.totalorder %s2789_s7, %s2782_s23 }
  0x49   : > { %p2792_p4 = por %p2791_p1, %p2790_p10 }
  0x4b   : > { %p2793_p6 = pnand %p2792_p4, %p2786_p5 }
  0x4d   : > { %2796 = shalt.err (!%p2793_p6)
}
  0x4e   : > { %2632 = dma.hbm_to_vmem [thread:$0]  (!%p3092_p11), %s555_s11, 128, %s558_s12, %s547_s15  }
  0x4f   : > { %566 = sbr.rel (%p3035_p8) target bundleno = 2615 (0xa37), region = 88  ;;  %s3103_s14 = sand.u32 (!%p3035_p8), 1, %s2865_s25  }
  0x50   : > { %s2410_s0 = sshll.u32 (!%p3035_p8), %s3103_s14, 3  ;;  %s569_s17 = scalar_lea.sflag (!%p3035_p8), [#allocation5], %s3103_s14 }
  0x51   : > { %s572_s28 = scalar_lea.vmem (!%p3035_p8), [#allocation4], %s2410_s0  ;;  %p3405_p12 = scmp.ne.s32.totalorder (!%p3035_p8), %s3394_s1, 0 }
  0x54   : > { %2848 = dma.done.wait (%p3405_p12), %s569_s17, 128  }
  0x55   : > { %2850 = vsyncadd (%p3405_p12), %s569_s17, 4294967168  ;;  %p3406_p3 = scmp.ne.s32.totalorder %s3392_s18, 0 }
  0x57   : > { %2852 = dma.done.wait (%p3406_p3), [#allocation8], 1024  }
  0x58   : > { %2854 = vsyncadd (%p3406_p3), [#allocation8], 4294966272  ;;  %vm664_vm0 = vcmask 261120   ;;  %v2888_v0 = vmov 0.0   ;;  %vm2889_vm1 = vmmov 0   ;;  %s3407_s18 = sld [smem:[#allocation20_spill]] }
  0x59   : > { %2496 = vmatprep.subr.mxu1 %v2888_v0  ;;  %2504 = vmatprep.mubr.msk.f32.mxu1 %vm2889_vm1, %v2888_v0  ;;  %2041 = vst.msk [vmem:[#allocation3] sm:$0xff] %vm664_vm0, %v2888_v0  ;;  %v3139_v5 = vld [vmem:[%s572_s28] sm:$0xff]  ;;  %v739_v8 = vld [vmem:[%s3356_s3 + $0x8] sm:$0xff]  ;;  %v738_v9 = vld [vmem:[%s3356_s3] sm:$0xff]  ;;  %vm1124_vm2 = vcmask 64512   ;;  %s3408_s17 = sld [smem:[#allocation23_spill]] }
  0x5a   : > { %2518 = vmatprep.subr.mxu0 %v2888_v0  ;;  %2526 = vmatprep.mubr.msk.f32.mxu0 %vm2889_vm1, %v2888_v0  ;;  %v741_v6 = vld [vmem:[%s3356_s3 + $0x18] sm:$0xff]  ;;  %v740_v7 = vld [vmem:[%s3356_s3 + $0x10] sm:$0xff]  ;;  %v2414_v10 = vld [vmem:[%s3355_s2] ss:$0 sm:$0xff]  ;;  %vm2138_vm3 = vcmask 523264   ;;  %s3409_s12 = sld [smem:[#allocation24_spill]] }
  0x5b   : > { %v2416_v15 = vld [vmem:[%s3357_s4] ss:$0 sm:$0xff]  ;;  %v822_v18 = vld [vmem:[%s3358_s5 + $0x18] sm:$0xff]  ;;  %v821_v19 = vld [vmem:[%s3358_s5 + $0x10] sm:$0xff]  ;;  %s3410_s1 = sld [smem:[#allocation15_spill]]  ;;  %s638_s16 = scalar_lea.vmem [#allocation10], %s2410_s0 }
  0x5c   : > { %2519 = vmatpush3.msra.mxu0 %v822_v18  ;;  %v820_v20 = vld [vmem:[%s3358_s5 + $0x8] sm:$0xff]  ;;  %v819_v21 = vld [vmem:[%s3358_s5] sm:$0xff]  ;;  %s3411_s20 = sld [smem:[#allocation25_spill]]  ;;  %s2273_s7 = sshll.u32 %s638_s16, 4  ;;  %s2274_s7 = int_to_ptr.vmem [resolvable:$true] %s2273_s7 }
  0x5d   : > { %2520 = vmatprep.subr.mxu0 %v2888_v0  ;;  %v2418_v48 = vld [vmem:[%s3359_s6] ss:$0 sm:$0xff]  ;;  %s3412_s19 = sld [smem:[#allocation26_spill]]  ;;  %s2260_s21 = scalar_lea.sflag [#allocation6], %s3103_s14 }
  0x5e   : > { %v656_v1 = vld [vmem:[%s3407_s18 + $0x18] sm:$0xff]  ;;  %v655_v2 = vld [vmem:[%s3407_s18 + $0x10] sm:$0xff]  ;;  %v654_v3 = vld [vmem:[%s3407_s18 + $0x8] sm:$0xff]  ;;  %2521 = vmatpush3.msra.mxu0 %v821_v19  ;;  %s3413_s11 = sld [smem:[#allocation27_spill]]  ;;  %s2797_s15 = scalar_lea.vmem %s2274_s7, 128 }
  0x5f   : > { %2497 = vmatpush3.msra.mxu1 %v656_v1  ;;  %v653_v4 = vld [vmem:[%s3407_s18] sm:$0xff]  ;;  %2522 = vmatprep.subr.mxu0 %v2888_v0  ;;  %p2798_p8 = scmp.ne.s32.totalorder %s2274_s7, %s2797_s15 }
  0x60   : > { %2498 = vmatprep.subr.mxu1 %v2888_v0  ;;  %2523 = vmatpush3.msra.mxu0 %v820_v20 }
  0x61   : > { %2499 = vmatpush3.msra.mxu1 %v655_v2  ;;  %2524 = vmatprep.subr.mxu0 %v2888_v0  ;;  %s2443_s23 = sshll.u32 %s3410_s1, 7  ;;  %p2799_p9 = pnand %p2798_p8, %p3076_p7 }
  0x62   : > { %2500 = vmatprep.subr.mxu1 %v2888_v0  ;;  %2525 = vmatpush3.msra.mxu0 %v819_v21 }
  0x63   : > { %2501 = vmatpush3.msra.mxu1 %v654_v3  ;;  %2527 = vmatmul.mubr.msk.f32.vlgmr.msra.gmra.mxu0 %vm664_vm0, %v3139_v5  ;;  %p2800_p11 = pneg %p2799_p9 }
  0x64   : > { %2502 = vmatprep.subr.mxu1 %v2888_v0  ;;  %2539 = vmatprep.subr.mxu0 %v2888_v0 }
  0x65   : > { %2503 = vmatpush3.msra.mxu1 %v653_v4  ;;  %2541 = vmatprep.mubr.msk.f32.mxu0 %vm2889_vm1, %v2888_v0 }
  0x66   : > { %2505 = vmatmul.mubr.msk.f32.vlgmr.msra.gmra.mxu1 %vm664_vm0, %v3139_v5  ;;  %2507 = vmatprep.subr.mxu1 %v2888_v0 }
  0x67   : > { %2508 = vmatpush3.msra.mxu1 %v741_v6  ;;  %2515 = vmatprep.mubr.msk.f32.mxu1 %vm2889_vm1, %v2888_v0 }
  0x68   : > { %2509 = vmatprep.subr.mxu1 %v2888_v0 }
  0x69   : > { %2510 = vmatpush3.msra.mxu1 %v740_v7 }
  0x6a   : > { %2511 = vmatprep.subr.mxu1 %v2888_v0 }
  0x6b   : > { %2512 = vmatpush3.msra.mxu1 %v739_v8 }
  0x6c   : > { %2513 = vmatprep.subr.mxu1 %v2888_v0 }
  0x6d   : > { %2514 = vmatpush3.msra.mxu1 %v738_v9 }
  0x6e   : > { %2516 = vmatmul.mubr.msk.f32.vlgmr.msra.gmra.mxu1 %vm664_vm0, %v3139_v5  ;;  %2529 = vmatprep.subr.mxu1 %v2888_v0 }
  0x6f   : > { %2531 = vmatprep.mubr.msk.f32.mxu1 %vm2889_vm1, %v2888_v0 }
 0x123   : > { %v896_v34 = vpop.f32.mrf.mxu0 }
 0x124   : > { %v897_v49 = vadd.f32 %v2418_v48, %v896_v34  ;;  %v1926_v34 = vld [vmem:[#allocation7 + $0x8] sm:$0xff] }
 0x125   : > { %v2528_v35 = vpop.f32.mrf.mxu0 }
 0x126   : > { %v734_v11 = vpop.f32.mrf.mxu1  ;;  %v1925_v35 = vld [vmem:[#allocation7] sm:$0xff] }
 0x127   : > { %v735_v12 = vadd.f32 %v2414_v10, %v734_v11 }
 0x128   : > { %v2506_v13 = vpop.f32.mrf.mxu1 }
 0x129   : > { %900 = vxpose.xlu0.b32.start.end [1/1] (short) (narrow) %v735_v12, 32 }
 0x12e   : > { %v815_v14 = vpop.f32.mrf.mxu1 }
 0x12f   : > { %v816_v17 = vadd.f32 %v2416_v15, %v815_v14 }
 0x130   : > { %v2517_v16 = vpop.f32.mrf.mxu1 }
 0x136   : > { %1060 = vxpose.xlu0.b32.start.end [1/1] (short) (narrow) %v816_v17, 32 }
 0x1a5   : > { %v916_v22 = vpop.trf.xlu0 }
 0x1a6   : > { %932 = vxpose.xlu1.b32.start.end [1/1] (short) (narrow) %v916_v22, 8 }
 0x1a9   : > { %v917_v23 = vpop.trf.xlu0 }
 0x1aa   : > { %964 = vxpose.xlu1.b32.start.end [1/1] (short) (narrow) %v917_v23, 8 }
 0x1ad   : > { %v918_v24 = vpop.trf.xlu0 }
 0x1ae   : > { %996 = vxpose.xlu1.b32.start.end [1/1] (short) (narrow) %v918_v24, 8 }
 0x1b1   : > { %v919_v25 = vpop.trf.xlu0 }
 0x1b2   : > { %1028 = vxpose.xlu1.b32.start.end [1/1] (short) (narrow) %v919_v25, 8 }
 0x1b5   : > { %v1076_v26 = vpop.trf.xlu0 }
 0x1b6   : > { %2530 = vmatpush3.msra.mxu1 %v1076_v26 }
 0x1b7   : > { %2534 = vmatprep.subr.mxu1 %v2888_v0 }
 0x1b9   : > { %v1077_v27 = vpop.trf.xlu0 }
 0x1bd   : > { %v1078_v28 = vpop.trf.xlu0 }
 0x1be   : > { %2540 = vmatpush3.msra.mxu0 %v1078_v28 }
 0x1bf   : > { %2549 = vmatprep.subr.mxu0 %v2888_v0 }
 0x1c1   : > { %v1079_v30 = vpop.trf.xlu0 }
 0x222   : > { %v948_v29 = vpop.trf.xlu1 }
 0x223   : > { %2532 = vmatmul.mubr.msk.f32.vlgmr.msra.gmra.mxu1 %vm1124_vm2, %v948_v29 }
 0x224   : > { %2535 = vmatpush3.msra.mxu1 %v1077_v27  ;;  %2536 = vmatprep.mubr.msk.f32.mxu1 %vm2889_vm1, %v2888_v0 }
 0x225   : > { %2544 = vmatprep.subr.mxu1 %v2888_v0 }
 0x226   : > { %v980_v31 = vpop.trf.xlu1 }
 0x227   : > { %2537 = vmatmul.mubr.msk.f32.vlgmr.msra.gmra.mxu1 %vm1124_vm2, %v980_v31  ;;  %v1927_v31 = vld [vmem:[#allocation7 + $0x10] sm:$0xff] }
 0x228   : > { %2545 = vmatpush3.msra.mxu1 %v1079_v30  ;;  %2546 = vmatprep.mubr.msk.f32.mxu1 %vm2889_vm1, %v2888_v0  ;;  %v1928_v30 = vld [vmem:[#allocation7 + $0x18] sm:$0xff] }
 0x229   : > { %2554 = vmatprep.subr.mxu1 %v2888_v0 }
 0x22a   : > { %v1012_v32 = vpop.trf.xlu1 }
 0x22b   : > { %2542 = vmatmul.mubr.msk.f32.vlgmr.msra.gmra.mxu0 %vm1124_vm2, %v1012_v32 }
 0x22c   : > { %2551 = vmatprep.mubr.msk.f32.mxu0 %vm2889_vm1, %v2888_v0 }
 0x22e   : > { %v1044_v33 = vpop.trf.xlu1 }
 0x22f   : > { %2547 = vmatmul.mubr.msk.f32.vlgmr.msra.gmra.mxu1 %vm1124_vm2, %v1044_v33 }
 0x230   : > { %2556 = vmatprep.mubr.msk.f32.mxu1 %vm2889_vm1, %v2888_v0 }
 0x2e3   : > { %v1194_v36 = vpop.f32.mrf.mxu1 }
 0x2e4   : > { %v1417_v37 = vsel %vm1124_vm2, %v1194_v36, -inf }
 0x2e5   : > { %1418 = vmax.xlane.f32.xlu1 %v1417_v37  ;;  %v2533_v38 = vpop.f32.mrf.mxu1 }
 0x2e7   : > { %v1267_v39 = vpop.f32.mrf.mxu1 }
 0x2e8   : > { %v1420_v40 = vsel %vm1124_vm2, %v1267_v39, -inf }
 0x2e9   : > { %1421 = vmax.xlane.f32.xlu0 %v1420_v40  ;;  %v2538_v41 = vpop.f32.mrf.mxu1 }
 0x2ea   : > { %v2432_v41 = vld [vmem:[%s3361_s8] ss:$0 sm:$0xff] }
 0x2eb   : > { %v1340_v42 = vpop.f32.mrf.mxu0 }
 0x2ec   : > { %v1423_v43 = vsel %vm1124_vm2, %v1340_v42, -inf }
 0x2ed   : > { %v2543_v44 = vpop.f32.mrf.mxu0  ;;  %1424 = vmax.xlane.f32.xlu1 %v1423_v43 }
 0x2ef   : > { %v1413_v45 = vpop.f32.mrf.mxu1 }
 0x2f0   : > { %v1426_v46 = vsel %vm1124_vm2, %v1413_v45, -inf }
 0x2f1   : > { %1427 = vmax.xlane.f32.xlu1 %v1426_v46  ;;  %v2548_v47 = vpop.f32.mrf.mxu1 }
 0x324   : > { %1092 = vxpose.xlu1.b32.start.end [1/1] (short) (narrow) %v897_v49, 32 }
 0x36e   : > { %v1419_v50 = vpop.xlane.xlu1 %1418 }
 0x36f   : > { %v1429_v51 = vsub.f32 %v1194_v36, %v1419_v50 }
 0x371   : > { %v1433_v52 = vmul.f32 1.442695, %v1429_v51 }
 0x372   : > { %v1422_v53 = vpop.xlane.xlu0 %1421 }
 0x373   : > { %2697 = vpow2.f32 %v1433_v52  ;;  %v1430_v54 = vsub.f32 %v1267_v39, %v1422_v53  ;;  %v2046_v52 = vld [vmem:[#allocation9 + $0x18] sm:$0xff]  ;;  %v2045_v53 = vld [vmem:[#allocation9 + $0x10] sm:$0xff] }
 0x375   : > { %v1435_v55 = vmul.f32 1.442695, %v1430_v54  ;;  %v2044_v54 = vld [vmem:[#allocation9 + $0x8] sm:$0xff] }
 0x376   : > { %v1425_v56 = vpop.xlane.xlu1 %1424 }
 0x377   : > { %2699 = vpow2.f32 %v1435_v55  ;;  %v1431_v57 = vsub.f32 %v1340_v42, %v1425_v56  ;;  %v2137_v55 = vld [vmem:[%s3366_s13 + $0x38] sm:$0xff]  ;;  %v2136_v56 = vld [vmem:[%s3366_s13 + $0x30] sm:$0xff] }
 0x379   : > { %v1437_v58 = vmul.f32 1.442695, %v1431_v57  ;;  %v2135_v57 = vld [vmem:[%s3366_s13 + $0x28] sm:$0xff] }
 0x37a   : > { %v1428_v59 = vpop.xlane.xlu1 %1427 }
 0x37b   : > { %2701 = vpow2.f32 %v1437_v58  ;;  %v1432_v60 = vsub.f32 %v1413_v45, %v1428_v59  ;;  %v2134_v58 = vld [vmem:[%s3366_s13 + $0x20] sm:$0xff]  ;;  %v2133_v59 = vld [vmem:[%s3366_s13 + $0x18] sm:$0xff] }
 0x37d   : > { %v1439_v61 = vmul.f32 1.442695, %v1432_v60 }
 0x37f   : > { %2703 = vpow2.f32 %v1439_v61 }
 0x380   : > { %v2698_v62 = vpop.eup %2697 }
 0x381   : > { %v1441_v63 = vsel %vm1124_vm2, %v2698_v62, 0.0 }
 0x382   : > { %1442 = vadd.xlane.f32.xlu0 %v1441_v63 }
 0x384   : > { %v2700_v1 = vpop.eup %2699 }
 0x385   : > { %v1444_v2 = vsel %vm1124_vm2, %v2700_v1, 0.0 }
 0x386   : > { %1445 = vadd.xlane.f32.xlu0 %v1444_v2 }
 0x388   : > { %v2702_v3 = vpop.eup %2701 }
 0x389   : > { %v1447_v4 = vsel %vm1124_vm2, %v2702_v3, 0.0 }
 0x38a   : > { %1448 = vadd.xlane.f32.xlu0 %v1447_v4 }
 0x38c   : > { %v2704_v6 = vpop.eup %2703 }
 0x38d   : > { %v1450_v7 = vsel %vm1124_vm2, %v2704_v6, 0.0 }
 0x38e   : > { %1451 = vadd.xlane.f32.xlu0 %v1450_v7 }
 0x3a0   : > { %v1108_v8 = vpop.trf.xlu1 }
 0x3a1   : > { %2550 = vmatpush3.xpose.msk.msra.mxu0 %vm1124_vm2, %v1108_v8  ;;  %v2132_v8 = vld [vmem:[%s3366_s13 + $0x10] sm:$0xff] }
 0x3a2   : > { %2559 = vmatprep.subr.mxu0 %v2888_v0 }
 0x3a4   : > { %2552 = vmatmul.mubr.msk.f32.vlgmr.msra.gmra.mxu0 %vm1124_vm2, %v2698_v62  ;;  %v1109_v9 = vpop.trf.xlu1 }
 0x3a5   : > { %2555 = vmatpush3.xpose.msk.msra.mxu1 %vm1124_vm2, %v1109_v9  ;;  %2561 = vmatprep.mubr.msk.f32.mxu0 %vm2889_vm1, %v2888_v0  ;;  %v2131_v9 = vld [vmem:[%s3366_s13 + $0x8] sm:$0xff] }
 0x3a6   : > { %2564 = vmatprep.subr.mxu1 %v2888_v0 }
 0x3a8   : > { %2557 = vmatmul.mubr.msk.f32.vlgmr.msra.gmra.mxu1 %vm1124_vm2, %v2700_v1  ;;  %v1110_v10 = vpop.trf.xlu1  ;;  %v2434_v1 = vld [vmem:[%s3362_s9] ss:$0 sm:$0xff] }
 0x3a9   : > { %2560 = vmatpush3.xpose.msk.msra.mxu0 %vm1124_vm2, %v1110_v10  ;;  %2566 = vmatprep.mubr.msk.f32.mxu1 %vm2889_vm1, %v2888_v0  ;;  %v2130_v10 = vld [vmem:[%s3366_s13] sm:$0xff] }
 0x3aa   : > { %2569 = vmatprep.subr.mxu0 %v2888_v0 }
 0x3ac   : > { %2562 = vmatmul.mubr.msk.f32.vlgmr.msra.gmra.mxu0 %vm1124_vm2, %v2702_v3  ;;  %v1111_v11 = vpop.trf.xlu1  ;;  %v2435_v3 = vld [vmem:[%s3363_s10] ss:$0 sm:$0xff] }
 0x3ad   : > { %2565 = vmatpush3.xpose.msk.msra.mxu1 %vm1124_vm2, %v1111_v11  ;;  %2577 = vmatprep.mubr.msk.f32.mxu0 %vm2889_vm1, %v2888_v0  ;;  %v2436_v11 = vld [vmem:[%s3408_s17] ss:$0 sm:$0xff] }
 0x3ae   : > { %2580 = vmatprep.subr.mxu1 %v2888_v0  ;;  %2570 = vmatpush3.msra.mxu0 %v1928_v30 }
 0x3af   : > { %2571 = vmatprep.subr.mxu0 %v2888_v0 }
 0x3b0   : > { %2567 = vmatmul.mubr.msk.f32.vlgmr.msra.gmra.mxu1 %vm1124_vm2, %v2704_v6  ;;  %2572 = vmatpush3.msra.mxu0 %v1927_v31 }
 0x3b1   : > { %2588 = vmatprep.mubr.msk.f32.mxu1 %vm2889_vm1, %v2888_v0  ;;  %2573 = vmatprep.subr.mxu0 %v2888_v0 }
 0x3b2   : > { %2574 = vmatpush3.msra.mxu0 %v1926_v34  ;;  %2581 = vmatpush3.msra.mxu1 %v2046_v52 }
 0x3b3   : > { %2575 = vmatprep.subr.mxu0 %v2888_v0  ;;  %2582 = vmatprep.subr.mxu1 %v2888_v0 }
 0x3b4   : > { %2576 = vmatpush3.msra.mxu0 %v1925_v35  ;;  %2583 = vmatpush3.msra.mxu1 %v2045_v53  ;;  %v2441_v35 = vld [vmem:[%s3412_s19] ss:$0 sm:$0xff] }
 0x3b5   : > { %2591 = vmatprep.subr.mxu0 %v2888_v0  ;;  %2584 = vmatprep.subr.mxu1 %v2888_v0 }
 0x3b6   : > { %2585 = vmatpush3.msra.mxu1 %v2044_v54 }
 0x3b7   : > { %2586 = vmatprep.subr.mxu1 %v2888_v0 }
 0x40b   : > { %v1443_v12 = vpop.xlane.xlu0 %1442 }
 0x40c   : > { %2705 = vrcp.f32 %v1443_v12 }
 0x40f   : > { %v1446_v13 = vpop.xlane.xlu0 %1445 }
 0x410   : > { %2707 = vrcp.f32 %v1446_v13 }
 0x413   : > { %v1449_v14 = vpop.xlane.xlu0 %1448 }
 0x414   : > { %2709 = vrcp.f32 %v1449_v14 }
 0x417   : > { %v1452_v15 = vpop.xlane.xlu0 %1451 }
 0x418   : > { %2711 = vrcp.f32 %v1452_v15 }
 0x419   : > { %v2706_v16 = vpop.eup %2705 }
 0x41d   : > { %v2708_v20 = vpop.eup %2707 }
 0x421   : > { %v2710_v24 = vpop.eup %2709 }
 0x425   : > { %v2712_v28 = vpop.eup %2711 }
 0x464   : > { %v1525_v17 = vpop.f32.mrf.mxu0 }
 0x465   : > { %v1758_v18 = vmul.f32 %v2706_v16, %v1525_v17  ;;  %v2129_v16 = vld [vmem:[#allocation3] sm:$0xff] }
 0x466   : > { %v2553_v19 = vpop.f32.mrf.mxu0 }
 0x467   : > { %1765 = vxpose.xlu0.b32.start.end [1/1] (short) (narrow) %v1758_v18, 8 }
 0x468   : > { %v1601_v21 = vpop.f32.mrf.mxu1 }
 0x469   : > { %v1760_v22 = vmul.f32 %v2708_v20, %v1601_v21 }
 0x46a   : > { %v2558_v23 = vpop.f32.mrf.mxu1 }
 0x46b   : > { %1797 = vxpose.xlu1.b32.start.end [1/1] (short) (narrow) %v1760_v22, 8 }
 0x46c   : > { %v1677_v25 = vpop.f32.mrf.mxu0 }
 0x46d   : > { %v1762_v26 = vmul.f32 %v2710_v24, %v1677_v25 }
 0x46e   : > { %v2563_v27 = vpop.f32.mrf.mxu0 }
 0x46f   : > { %1829 = vxpose.xlu1.b32.start.end [1/1] (short) (narrow) %v1762_v26, 8 }
 0x470   : > { %v1753_v29 = vpop.f32.mrf.mxu1 }
 0x471   : > { %v1764_v32 = vmul.f32 %v2712_v28, %v1753_v29 }
 0x472   : > { %v2568_v33 = vpop.f32.mrf.mxu1 }
 0x473   : > { %1861 = vxpose.xlu1.b32.start.end [1/1] (short) (narrow) %v1764_v32, 8  ;;  %v2440_v33 = vld [vmem:[%s3411_s20] ss:$0 sm:$0xff]  ;;  %s2890_s20 = smov [#allocation10]  }
 0x474   : > { %s2801_s1 = sshll.u32 %s2890_s20, 4  ;;  %s2802_s1 = int_to_ptr.vmem [resolvable:$false] %s2801_s1 }
 0x475   : > { %s2803_s0 = scalar_lea.vmem %s2802_s1, 256  ;;  %p2804_p2 = scmp.lt.s32.totalorder %s2274_s7, %s2802_s1 }
 0x476   : > { %p2805_p13 = scmp.lt.s32.totalorder %s2803_s0, %s2797_s15 }
 0x478   : > { %p2806_p0 = por %p2805_p13, %p2804_p2 }
 0x47a   : > { %p2807_p5 = pnand %p2806_p0, %p2800_p11 }
 0x4e3   : > { %v1781_v36 = vpop.trf.xlu0 }
 0x4e4   : > { %1893 = vxpose.xlu0.b32.start [1/4] (short) (narrow) %v1781_v36, 8 }
 0x4e7   : > { %v1813_v37 = vpop.trf.xlu1 }
 0x4e8   : > { %1894 = vxpose.xlu0.b32.cont [2/4] (short) (narrow) %v1813_v37, 8 }
 0x4eb   : > { %v1845_v38 = vpop.trf.xlu1 }
 0x4ec   : > { %1895 = vxpose.xlu0.b32.cont [3/4] (short) (narrow) %v1845_v38, 8 }
 0x4ef   : > { %v1877_v39 = vpop.trf.xlu1 }
 0x4f0   : > { %1896 = vxpose.xlu0.b32.end [4/4] (short) (narrow) %v1877_v39, 8 }
 0x560   : > { %v1909_v40 = vpop.trf.xlu0 }
 0x561   : > { %2578 = vmatmul.mubr.msk.f32.vlgmr.msra.gmra.mxu0 %vm664_vm0, %v1909_v40 }
 0x562   : > { %2607 = vmatprep.mubr.msk.f32.mxu0 %vm2889_vm1, %v2888_v0  ;;  %2592 = vmatpush3.msra.mxu0 %v2137_v55 }
 0x563   : > { %2593 = vmatprep.subr.mxu0 %v2888_v0 }
 0x564   : > { %2594 = vmatpush3.msra.mxu0 %v2136_v56 }
 0x565   : > { %2595 = vmatprep.subr.mxu0 %v2888_v0 }
 0x566   : > { %2596 = vmatpush3.msra.mxu0 %v2135_v57 }
 0x567   : > { %2597 = vmatprep.subr.mxu0 %v2888_v0 }
 0x568   : > { %2598 = vmatpush3.msra.mxu0 %v2134_v58 }
 0x569   : > { %2599 = vmatprep.subr.mxu0 %v2888_v0 }
 0x56a   : > { %2600 = vmatpush3.msra.mxu0 %v2133_v59 }
 0x56b   : > { %2601 = vmatprep.subr.mxu0 %v2888_v0 }
 0x56c   : > { %2602 = vmatpush3.msra.mxu0 %v2132_v8 }
 0x56d   : > { %2603 = vmatprep.subr.mxu0 %v2888_v0 }
 0x56e   : > { %2604 = vmatpush3.msra.mxu0 %v2131_v9 }
 0x56f   : > { %2605 = vmatprep.subr.mxu0 %v2888_v0  ;;  %v2439_v0 = vld [vmem:[%s3409_s12] ss:$0 sm:$0xff]  ;;  %s2271_s12 = scalar_lea.hbm %s3413_s11, %s2443_s23 }
 0x570   : > { %2606 = vmatpush3.msra.mxu0 %v2130_v10 }
 0x621   : > { %v2005_v42 = vpop.f32.mrf.mxu0 }
 0x622   : > { %v2006_v43 = vadd.f32 %v2432_v41, %v2005_v42 }
 0x623   : > { %v2579_v44 = vpop.f32.mrf.mxu0 }
 0x624   : > { %v2009_v45 = vadd.f32 %v2006_v43, %v3139_v5  ;;  %v2043_v5 = vld [vmem:[#allocation9] sm:$0xff] }
 0x625   : > { %2587 = vmatpush3.msra.mxu1 %v2043_v5 }
 0x626   : > { %v2012_v46 = vsel %vm664_vm0, %v2009_v45, 0.0 }
 0x627   : > { %2013 = vadd.xlane.f32.xlu1 %v2012_v46 }
 0x6b0   : > { %v2014_v47 = vpop.xlane.xlu1 %2013 }
 0x6b1   : > { %v2016_v48 = vmul.f32 0.03125, %v2014_v47 }
 0x6b3   : > { %v2017_v49 = vsub.f32 %v2009_v45, %v2016_v48 }
 0x6b5   : > { %v2018_v50 = vmul.f32 %v2017_v49, %v2017_v49 }
 0x6b7   : > { %v2019_v51 = vsel %vm664_vm0, %v2018_v50, 0.0 }
 0x6b8   : > { %2020 = vadd.xlane.f32.xlu0 %v2019_v51 }
 0x741   : > { %v2021_v60 = vpop.xlane.xlu0 %2020 }
 0x742   : > { %v2022_v61 = vmul.f32 0.03125, %v2021_v60 }
 0x744   : > { %v2023_v62 = vadd.f32 1e-05, %v2022_v61 }
 0x746   : > { %2713 = vrsqrt.f32 %v2023_v62 }
 0x753   : > { %v2714_v63 = vpop.eup %2713 }
 0x754   : > { %v2025_v2 = vmul.f32 %v2714_v63, %v2017_v49 }
 0x756   : > { %v2032_v4 = vmul.f32 %v2434_v1, %v2025_v2 }
 0x758   : > { %v2039_v6 = vadd.f32 %v2435_v3, %v2032_v4 }
 0x75a   : > { %2040 = vst.msk [vmem:[#allocation2] sm:$0xff] %vm664_vm0, %v2039_v6 }
 0x761   : > { %v2042_v7 = vld [vmem:[#allocation2] sm:$0xff] }
 0x762   : > { %2589 = vmatmul.mubr.msk.f32.vlgmr.msra.gmra.mxu1 %vm664_vm0, %v2042_v7 }
 0x822   : > { %v2124_v12 = vpop.f32.mrf.mxu1 }
 0x823   : > { %v2125_v13 = vadd.f32 %v2436_v11, %v2124_v12 }
 0x824   : > { %v2590_v14 = vpop.f32.mrf.mxu1 }
 0x825   : > { %v2128_v15 = vmax.f32 %v2125_v13, 0.0 }
 0x827   : > { %2608 = vmatmul.mubr.msk.f32.vlgmr.msra.gmra.mxu0 %vm2138_vm3, %v2128_v15 }
 0x8e7   : > { %v2208_v17 = vpop.f32.mrf.mxu0 }
 0x8e8   : > { %v2212_v18 = vadd.f32 %v2208_v17, %v2129_v16 }
 0x8e9   : > { %v2609_v19 = vpop.f32.mrf.mxu0 }
 0x8ea   : > { %2213 = vst.msk [vmem:[#allocation3] sm:$0xff] %vm664_vm0, %v2212_v18 }
 0x8f1   : > { %v2217_v20 = vld [vmem:[#allocation3] sm:$0xff] }
 0x8f2   : > { %v2225_v21 = vadd.f32 %v2439_v0, %v2217_v20 }
 0x8f4   : > { %v2227_v22 = vadd.f32 %v2225_v21, %v2042_v7 }
 0x8f6   : > { %v2230_v23 = vsel %vm664_vm0, %v2227_v22, 0.0 }
 0x8f7   : > { %2231 = vadd.xlane.f32.xlu1 %v2230_v23 }
 0x980   : > { %v2232_v24 = vpop.xlane.xlu1 %2231 }
 0x981   : > { %v2234_v25 = vmul.f32 0.03125, %v2232_v24 }
 0x983   : > { %v2235_v26 = vsub.f32 %v2227_v22, %v2234_v25 }
 0x985   : > { %v2236_v27 = vmul.f32 %v2235_v26, %v2235_v26 }
 0x987   : > { %v2237_v28 = vsel %vm664_vm0, %v2236_v27, 0.0 }
 0x988   : > { %2238 = vadd.xlane.f32.xlu1 %v2237_v28 }
 0xa11   : > { %v2239_v29 = vpop.xlane.xlu1 %2238 }
 0xa12   : > { %v2240_v30 = vmul.f32 0.03125, %v2239_v29 }
 0xa14   : > { %v2241_v31 = vadd.f32 1e-05, %v2240_v30 }
 0xa16   : > { %2715 = vrsqrt.f32 %v2241_v31 }
 0xa23   : > { %v2716_v32 = vpop.eup %2715 }
 0xa24   : > { %v2243_v34 = vmul.f32 %v2716_v32, %v2235_v26 }
 0xa26   : > { %v2250_v36 = vmul.f32 %v2440_v33, %v2243_v34 }
 0xa28   : > { %v2257_v37 = vadd.f32 %v2441_v35, %v2250_v36 }
 0xa2a   : > { %2258 = vst.msk [vmem:[%s638_s16] sm:$0xff] %vm664_vm0, %v2257_v37 }
 0xa2b   : > { %2810 = shalt.err (!%p2807_p5)
}
 0xa2c   : > { %s2811_s30 = scalar_lea.hbm %s2271_s12, 128  ;;  %s2815_s19 = scalar_lea.hbm %s3413_s11, 256 }
 0xa2d   : > { %p2812_p10 = scmp.ne.s32.totalorder %s2271_s12, %s2811_s30  ;;  %p2816_p6 = scmp.lt.s32.totalorder %s2271_s12, %s3413_s11 }
 0xa2e   : > { %p2817_p12 = scmp.lt.s32.totalorder %s2815_s19, %s2811_s30 }
 0xa2f   : > { %p2813_p1 = pnand %p2812_p10, %p3076_p7 }
 0xa30   : > { %p2818_p3 = por %p2817_p12, %p2816_p6 }
 0xa31   : > { %p2814_p4 = pneg %p2813_p1 }
 0xa33   : > { %p2819_p8 = pnand %p2818_p3, %p2814_p4 }
 0xa35   : > { %2822 = shalt.err (!%p2819_p8)
}
 0xa36   : > { %2620 = dma.vmem_to_hbm [thread:$0]  (%p3076_p7), %s2274_s7, 128, %s2271_s12, %s2260_s21  }
 0xa37 PF: > { %s3414_s17 = sld [smem:[#allocation14_spill]]  ;;  %p3417_p11 = scmp.ge.s32.totalorder %s2881_s29, 2 }
 0xa38   : > { %s3415_s28 = sld [smem:[#allocation17_spill]] }
 0xa3d   : > { %s2285_s15 = sand.u32 1, %s3414_s17  }
 0xa3e   : > { %p3416_p9 = scmp.ne.s32.totalorder %s3415_s28, 0  ;;  %s2286_s20 = scalar_lea.sflag [#allocation6], %s2285_s15 }
 0xa40   : > { %p2634_p2 = pnand %p3417_p11, %p3416_p9 }
 0xa42   : > { %p2635_p13 = pneg %p2634_p2 }
 0xa44   : > { %2856 = dma.done.wait (%p2635_p13), %s2286_s20, 128  }
 0xa45   : > { %2858 = vsyncadd (%p2635_p13), %s2286_s20, 4294967168  ;;  %s34_s29 = sadd.s32 1, %s2881_s29   ;;  %s3418_s27 = sld [smem:[#allocation16_spill]] }
 0xa46   : > { %p31_p0 = scmp.ge.s32.totalorder %s34_s29, 4   ;;  %s3419_s28 = sld [smem:[#allocation18_spill]] }
 0xa47   : > { %s3420_s24 = smov %s2865_s25  ;;  %s3421_s25 = smov %s2869_s26 }
 0xa48   : > { %s3422_s26 = smov %s3085_s22  ;;  %33 = sbr.rel (!%p31_p0) target bundleno = 17 (0x11), region = 156 }
 0xa4d   :  { %2291 = vsyncpa [#allocation5], 1 }
 0xa4e   :  { %2293 = vsyncpa [#allocation5 + $0x1], 1 }
 0xa4f   :  { %2294 = vsyncpa [#allocation8], 1 }
 0xa50   :  { %2295 = vsyncpa [#allocation6], 1 }
 0xa51   :  { %2297 = vsyncpa [#allocation6 + $0x1], 1 }

// kernel: tpu_custom_call.1
= control target key start
LH: loop header
LB: loop body
LE: loop exit
PB: predicated region body
PF: predicated region fallthrough
CT: control target
= control target key end

     0   :  { %s3353_s0 = inlined_call_operand.hbm [shape: f32[16,32], index: 0, kind: input, shape index: {}]   ;;  %s3354_s1 = inlined_call_operand.vmem [shape: f32[32,32], index: 1, kind: input, shape index: {}]   ;;  %s3355_s2 = inlined_call_operand.vmem [shape: f32[1,32], index: 2, kind: input, shape index: {}]   ;;  %s3356_s3 = inlined_call_operand.vmem [shape: f32[32,32], index: 3, kind: input, shape index: {}]   ;;  %s3357_s4 = inlined_call_operand.vmem [shape: f32[1,32], index: 4, kind: input, shape index: {}]   ;;  %s3358_s5 = inlined_call_operand.vmem [shape: f32[32,32], index: 5, kind: input, shape index: {}]   ;;  %s3359_s6 = inlined_call_operand.vmem [shape: f32[1,32], index: 6, kind: input, shape index: {}]   ;;  %s3360_s7 = inlined_call_operand.hbm [shape: f32[32,32], index: 7, kind: input, shape index: {}]   ;;  %s3361_s8 = inlined_call_operand.vmem [shape: f32[1,32], index: 8, kind: input, shape index: {}]   ;;  %s3362_s9 = inlined_call_operand.vmem [shape: f32[1,32], index: 9, kind: input, shape index: {}]   ;;  %s3363_s10 = inlined_call_operand.vmem [shape: f32[1,32], index: 10, kind: input, shape index: {}]   ;;  %s3364_s11 = inlined_call_operand.hbm [shape: f32[32,64], index: 11, kind: input, shape index: {}]   ;;  %s3365_s12 = inlined_call_operand.vmem [shape: f32[1,64], index: 12, kind: input, shape index: {}]   ;;  %s3366_s13 = inlined_call_operand.vmem [shape: f32[64,32], index: 13, kind: input, shape index: {}]   ;;  %s3367_s14 = inlined_call_operand.vmem [shape: f32[1,32], index: 14, kind: input, shape index: {}]   ;;  %s3368_s15 = inlined_call_operand.vmem [shape: f32[1,32], index: 15, kind: input, shape index: {}]   ;;  %s3369_s16 = inlined_call_operand.vmem [shape: f32[1,32], index: 16, kind: input, shape index: {}]   ;;  %s3370_s17 = inlined_call_operand.hbm [shape: f32[16,32], index: 17, kind: output, shape index: {}]  }
   0x1   :  { %3380 = sst [smem:[#allocation19_spill]] %s3353_s0 }
   0x2   :  { %3381 = sst [smem:[#allocation20_spill]] %s3354_s1 }
   0x3   :  { %3382 = sst [smem:[#allocation21_spill]] %s3360_s7 }
   0x4   :  { %3383 = sst [smem:[#allocation22_spill]] %s3364_s11 }
   0x5   :  { %3384 = sst [smem:[#allocation23_spill]] %s3365_s12 }
   0x6   :  { %3385 = sst [smem:[#allocation24_spill]] %s3367_s14 }
   0x7   :  { %3386 = sst [smem:[#allocation25_spill]] %s3368_s15 }
   0x8   :  { %3387 = sst [smem:[#allocation26_spill]] %s3369_s16 }
   0x9   :  { %3388 = sst [smem:[#allocation27_spill]] %s3370_s17 }
   0xa   :  { %22 = vsyncpa [#allocation5], 0 }
   0xb   :  { %24 = vsyncpa [#allocation5 + $0x1], 0 }
   0xc   :  { %25 = vsyncpa [#allocation8], 0 }
   0xd   :  { %26 = vsyncpa [#allocation6], 0 }
   0xe   :  { %28 = vsyncpa [#allocation6 + $0x1], 0  ;;  %s2981_s24 = smov 0   ;;  %s2983_s25 = smov 0  }
   0xf   :  { %s2985_s26 = smov 0   ;;  %s2987_s27 = smov 0  }
  0x10   :  { %s2989_s28 = smov 0   ;;  %s2991_s29 = smov 0  }
  0x11 LB: > { %3389 = sst [smem:[#allocation14_spill]] %s2861_s24  ;;  %s2399_s0 = sadd.s32 4294967295, %s2881_s29   ;;  %s2881_s29 = sphi %s2991_s29, %s34_s29   ;;  %s2877_s28 = sphi %s2989_s28, %s3419_s28   ;;  %s2873_s27 = sphi %s2987_s27, %s3418_s27   ;;  %s2869_s26 = sphi %s2985_s26, %s3422_s26   ;;  %s2865_s25 = sphi %s2983_s25, %s3421_s25   ;;  %s2861_s24 = sphi %s2981_s24, %s3420_s24  }
  0x12   : > { %3390 = sst [smem:[#allocation15_spill]] %s2873_s27  ;;  %s2400_s30 = sadd.s32 4294967294, %s2881_s29  }
  0x13   : > { %3391 = sst [smem:[#allocation16_spill]] %s2877_s28  ;;  %p66_p0 = scmp.ne.s32.totalorder %s2865_s25, %s2861_s24 }
  0x14   : > { %p3015_p1 = scmp.eq.s32.totalorder %s2399_s0, 0  ;;  %p3019_p2 = scmp.eq.s32.totalorder %s2399_s0, 1 }
  0x15   : > { %p447_p3 = scmp.eq.s32.totalorder %s2400_s30, 1  ;;  %p2401_p5 = scmp.ge.s32.totalorder %s2881_s29, 1 }
  0x16   : > { %s3392_s18 = scalar_select %p3015_p1, 1, 0 }
  0x17   : > { %p3025_p4 = por %p3015_p1, %p66_p0  ;;  %p3030_p6 = por %p447_p3, %p66_p0 }
  0x18   : > { %p454_p7 = scmp.lt.s32.totalorder %s2881_s29, 3  ;;  %s2883_s22 = smov [#allocation7]  }
  0x19   : > { %s3394_s1 = scalar_select %p3025_p4, 1, 0 }
  0x1a   : > { %s3395_s20 = scalar_select %p3030_p6, 1, 0 }
  0x1b   : > { %p3035_p8 = pnand %p2401_p5, %p454_p7  ;;  %s484_s23 = sshll.u32 %s2883_s22, 4  ;;  %s485_s23 = int_to_ptr.vmem [resolvable:$true] %s484_s23 }
  0x1c   : > { %3396 = sst [smem:[#allocation17_spill]] %s3395_s20  ;;  %s2884_s30 = smov [#allocation9]  }
  0x1d   : > { %p2622_p9 = pneg %p3035_p8  ;;  %s508_s20 = sshll.u32 %s2884_s30, 4  ;;  %s509_s20 = int_to_ptr.vmem [resolvable:$true] %s508_s20 }
  0x1e   : > { %s2728_s24 = scalar_lea.vmem %s485_s23, 512  ;;  %p2736_p5 = scmp.lt.s32.totalorder %s485_s23, %s485_s23 }
  0x1f   : > { %p3044_p11 = pnand %p2622_p9, %p3015_p1  ;;  %p2729_p13 = scmp.ne.s32.totalorder %s485_s23, %s2728_s24 }
  0x20   : > { %p2737_p7 = scmp.lt.s32.totalorder %s2728_s24, %s2728_s24 }
  0x21   : > { %p2719_p12 = pneg %p3044_p11 }
  0x22   : > { %p2738_p10 = por %p2737_p7, %p2736_p5 }
  0x23   : > { %p2731_p0 = pnand %p2729_p13, %p2719_p12 }
  0x25   : > { %p2732_p3 = pneg %p2731_p0 }
  0x27   : > { %p2739_p9 = pnand %p2738_p10, %p2732_p3 }
  0x29   : > { %2742 = shalt.err (!%p2739_p9)
}
  0x2a   : > { %s2885_s22 = smov 128   ;;  %s2886_s17 = smov 8  }
  0x2b   : > { %s3399_s7 = sld [smem:[#allocation21_spill]]  ;;  %s2754_s15 = scalar_lea.vmem %s509_s20, 512 }
  0x2c   : > { %p2755_p6 = scmp.ne.s32.totalorder %s509_s20, %s2754_s15  ;;  %p2762_p1 = scmp.lt.s32.totalorder %s509_s20, %s509_s20 }
  0x2d   : > { %p2763_p4 = scmp.lt.s32.totalorder %s2754_s15, %s2754_s15 }
  0x2e   : > { %p2757_p13 = pnand %p2755_p6, %p2719_p12 }
  0x2f   : > { %p2764_p5 = por %p2763_p4, %p2762_p1 }
  0x30   : > { %p2758_p0 = pneg %p2757_p13 }
  0x31   : > { %2625 = dma.hbm_to_vmem [thread:$0]  (!%p3044_p11), %s3399_s7, 512, %s485_s23, [#allocation8], %s2885_s22, %s2885_s22, %s2886_s17  }
  0x32   : > { %p2765_p10 = pnand %p2764_p5, %p2758_p0 }
  0x34   : > { %2768 = shalt.err (!%p2765_p10)
}
  0x35   : > { %s3400_s11 = sld [smem:[#allocation22_spill]]  ;;  %s46_s15 = sadd.s32 1, %s2877_s28 }
  0x36   : > { %s53_s16 = sadd.s32 1, %s2869_s26  ;;  %p48_p1 = scmp.ge.s32.totalorder %s46_s15, 2 }
  0x37   : > { %p60_p4 = scmp.ne.s32.totalorder %s2869_s26, %s2865_s25  ;;  %p61_p6 = scmp.eq.s32.totalorder %s2881_s29, 0 }
  0x38   : > { %p2639_p12 = scmp.lt.s32.totalorder %s2881_s29, 2  ;;  %s3424_s15 = smov (%p48_p1, %s46_s15), 0 }
  0x39   : > { %3401 = sst [smem:[#allocation18_spill]] %s3424_s15  ;;  %p62_p3 = por %p61_p6, %p60_p4 }
  0x3a   : > { %p3076_p7 = por %p3019_p2, %p60_p4  ;;  %s50_s23 = ssub.s32 %s2877_s28, %s3424_s15 }
  0x3b   : > { %2628 = dma.hbm_to_vmem [thread:$0]  (!%p3044_p11), %s3400_s11, 512, %s509_s20, [#allocation8], %s2885_s22, %s2885_s22, %s2886_s17  }
  0x3c   : > { %s546_s0 = sand.u32 1, %s2869_s26   ;;  %p51_p9 = scmp.eq.s32.totalorder %s50_s23, 0 }
  0x3d   : > { %s2407_s17 = sshll.u32 %s546_s0, 3  ;;  %s2408_s20 = sshll.u32 %s2877_s28, 7 }
  0x3e   : > { %s3085_s22 = scalar_select %p51_p9, %s2869_s26, %s53_s16  }
  0x3f   : > { %s3403_s7 = sld [smem:[#allocation19_spill]]  ;;  %s550_s14 = scalar_lea.vmem [#allocation4], %s2407_s17 }
  0x40   : > { %s557_s12 = sshll.u32 %s550_s14, 4  ;;  %p3092_p11 = pnand %p2639_p12, %p62_p3  ;;  %s558_s12 = int_to_ptr.vmem [resolvable:$true] %s557_s12 }
  0x41   : > { %s547_s15 = scalar_lea.sflag [#allocation5], %s546_s0  ;;  %s2782_s23 = scalar_lea.vmem %s558_s12, 128 }
  0x42   : > { %p2771_p2 = pneg %p3092_p11  ;;  %p2783_p13 = scmp.ne.s32.totalorder %s558_s12, %s2782_s23 }
  0x43   : > { %s2887_s16 = smov [#allocation4]  }
  0x44   : > { %p2785_p0 = pnand %p2783_p13, %p2771_p2  ;;  %s2787_s28 = sshll.u32 %s2887_s16, 4  ;;  %s2788_s28 = int_to_ptr.vmem [resolvable:$false] %s2787_s28 }
  0x45   : > { %s555_s11 = scalar_lea.hbm %s3403_s7, %s2408_s20  ;;  %s2789_s7 = scalar_lea.vmem %s2788_s28, 256 }
  0x46   : > { %p2786_p5 = pneg %p2785_p0  ;;  %p2790_p10 = scmp.lt.s32.totalorder %s558_s12, %s2788_s28 }
  0x47   : > { %p2791_p1 = scmp.lt.s32.totalorder %s2789_s7, %s2782_s23 }
  0x49   : > { %p2792_p4 = por %p2791_p1, %p2790_p10 }
  0x4b   : > { %p2793_p6 = pnand %p2792_p4, %p2786_p5 }
  0x4d   : > { %2796 = shalt.err (!%p2793_p6)
}
  0x4e   : > { %2632 = dma.hbm_to_vmem [thread:$0]  (!%p3092_p11), %s555_s11, 128, %s558_s12, %s547_s15  }
  0x4f   : > { %566 = sbr.rel (%p3035_p8) target bundleno = 2615 (0xa37), region = 88  ;;  %s3103_s14 = sand.u32 (!%p3035_p8), 1, %s2865_s25  }
  0x50   : > { %s2410_s0 = sshll.u32 (!%p3035_p8), %s3103_s14, 3  ;;  %s569_s17 = scalar_lea.sflag (!%p3035_p8), [#allocation5], %s3103_s14 }
  0x51   : > { %s572_s28 = scalar_lea.vmem (!%p3035_p8), [#allocation4], %s2410_s0  ;;  %p3405_p12 = scmp.ne.s32.totalorder (!%p3035_p8), %s3394_s1, 0 }
  0x54   : > { %2848 = dma.done.wait (%p3405_p12), %s569_s17, 128  }
  0x55   : > { %2850 = vsyncadd (%p3405_p12), %s569_s17, 4294967168  ;;  %p3406_p3 = scmp.ne.s32.totalorder %s3392_s18, 0 }
  0x57   : > { %2852 = dma.done.wait (%p3406_p3), [#allocation8], 1024  }
  0x58   : > { %2854 = vsyncadd (%p3406_p3), [#allocation8], 4294966272  ;;  %vm664_vm0 = vcmask 261120   ;;  %v2888_v0 = vmov 0.0   ;;  %vm2889_vm1 = vmmov 0   ;;  %s3407_s18 = sld [smem:[#allocation20_spill]] }
  0x59   : > { %2496 = vmatprep.subr.mxu1 %v2888_v0  ;;  %2504 = vmatprep.mubr.msk.f32.mxu1 %vm2889_vm1, %v2888_v0  ;;  %2041 = vst.msk [vmem:[#allocation3] sm:$0xff] %vm664_vm0, %v2888_v0  ;;  %v3139_v5 = vld [vmem:[%s572_s28] sm:$0xff]  ;;  %v739_v8 = vld [vmem:[%s3356_s3 + $0x8] sm:$0xff]  ;;  %v738_v9 = vld [vmem:[%s3356_s3] sm:$0xff]  ;;  %vm1124_vm2 = vcmask 64512   ;;  %s3408_s17 = sld [smem:[#allocation23_spill]] }
  0x5a   : > { %2518 = vmatprep.subr.mxu0 %v2888_v0  ;;  %2526 = vmatprep.mubr.msk.f32.mxu0 %vm2889_vm1, %v2888_v0  ;;  %v741_v6 = vld [vmem:[%s3356_s3 + $0x18] sm:$0xff]  ;;  %v740_v7 = vld [vmem:[%s3356_s3 + $0x10] sm:$0xff]  ;;  %v2414_v10 = vld [vmem:[%s3355_s2] ss:$0 sm:$0xff]  ;;  %vm2138_vm3 = vcmask 523264   ;;  %s3409_s12 = sld [smem:[#allocation24_spill]] }
  0x5b   : > { %v2416_v15 = vld [vmem:[%s3357_s4] ss:$0 sm:$0xff]  ;;  %v822_v18 = vld [vmem:[%s3358_s5 + $0x18] sm:$0xff]  ;;  %v821_v19 = vld [vmem:[%s3358_s5 + $0x10] sm:$0xff]  ;;  %s3410_s1 = sld [smem:[#allocation15_spill]]  ;;  %s638_s16 = scalar_lea.vmem [#allocation10], %s2410_s0 }
  0x5c   : > { %2519 = vmatpush3.msra.mxu0 %v822_v18  ;;  %v820_v20 = vld [vmem:[%s3358_s5 + $0x8] sm:$0xff]  ;;  %v819_v21 = vld [vmem:[%s3358_s5] sm:$0xff]  ;;  %s3411_s20 = sld [smem:[#allocation25_spill]]  ;;  %s2273_s7 = sshll.u32 %s638_s16, 4  ;;  %s2274_s7 = int_to_ptr.vmem [resolvable:$true] %s2273_s7 }
  0x5d   : > { %2520 = vmatprep.subr.mxu0 %v2888_v0  ;;  %v2418_v48 = vld [vmem:[%s3359_s6] ss:$0 sm:$0xff]  ;;  %s3412_s19 = sld [smem:[#allocation26_spill]]  ;;  %s2260_s21 = scalar_lea.sflag [#allocation6], %s3103_s14 }
  0x5e   : > { %v656_v1 = vld [vmem:[%s3407_s18 + $0x18] sm:$0xff]  ;;  %v655_v2 = vld [vmem:[%s3407_s18 + $0x10] sm:$0xff]  ;;  %v654_v3 = vld [vmem:[%s3407_s18 + $0x8] sm:$0xff]  ;;  %2521 = vmatpush3.msra.mxu0 %v821_v19  ;;  %s3413_s11 = sld [smem:[#allocation27_spill]]  ;;  %s2797_s15 = scalar_lea.vmem %s2274_s7, 128 }
  0x5f   : > { %2497 = vmatpush3.msra.mxu1 %v656_v1  ;;  %v653_v4 = vld [vmem:[%s3407_s18] sm:$0xff]  ;;  %2522 = vmatprep.subr.mxu0 %v2888_v0  ;;  %p2798_p8 = scmp.ne.s32.totalorder %s2274_s7, %s2797_s15 }
  0x60   : > { %2498 = vmatprep.subr.mxu1 %v2888_v0  ;;  %2523 = vmatpush3.msra.mxu0 %v820_v20 }
  0x61   : > { %2499 = vmatpush3.msra.mxu1 %v655_v2  ;;  %2524 = vmatprep.subr.mxu0 %v2888_v0  ;;  %s2443_s23 = sshll.u32 %s3410_s1, 7  ;;  %p2799_p9 = pnand %p2798_p8, %p3076_p7 }
  0x62   : > { %2500 = vmatprep.subr.mxu1 %v2888_v0  ;;  %2525 = vmatpush3.msra.mxu0 %v819_v21 }
  0x63   : > { %2501 = vmatpush3.msra.mxu1 %v654_v3  ;;  %2527 = vmatmul.mubr.msk.f32.vlgmr.msra.gmra.mxu0 %vm664_vm0, %v3139_v5  ;;  %p2800_p11 = pneg %p2799_p9 }
  0x64   : > { %2502 = vmatprep.subr.mxu1 %v2888_v0  ;;  %2539 = vmatprep.subr.mxu0 %v2888_v0 }
  0x65   : > { %2503 = vmatpush3.msra.mxu1 %v653_v4  ;;  %2541 = vmatprep.mubr.msk.f32.mxu0 %vm2889_vm1, %v2888_v0 }
  0x66   : > { %2505 = vmatmul.mubr.msk.f32.vlgmr.msra.gmra.mxu1 %vm664_vm0, %v3139_v5  ;;  %2507 = vmatprep.subr.mxu1 %v2888_v0 }
  0x67   : > { %2508 = vmatpush3.msra.mxu1 %v741_v6  ;;  %2515 = vmatprep.mubr.msk.f32.mxu1 %vm2889_vm1, %v2888_v0 }
  0x68   : > { %2509 = vmatprep.subr.mxu1 %v2888_v0 }
  0x69   : > { %2510 = vmatpush3.msra.mxu1 %v740_v7 }
  0x6a   : > { %2511 = vmatprep.subr.mxu1 %v2888_v0 }
  0x6b   : > { %2512 = vmatpush3.msra.mxu1 %v739_v8 }
  0x6c   : > { %2513 = vmatprep.subr.mxu1 %v2888_v0 }
  0x6d   : > { %2514 = vmatpush3.msra.mxu1 %v738_v9 }
  0x6e   : > { %2516 = vmatmul.mubr.msk.f32.vlgmr.msra.gmra.mxu1 %vm664_vm0, %v3139_v5  ;;  %2529 = vmatprep.subr.mxu1 %v2888_v0 }
  0x6f   : > { %2531 = vmatprep.mubr.msk.f32.mxu1 %vm2889_vm1, %v2888_v0 }
 0x123   : > { %v896_v34 = vpop.f32.mrf.mxu0 }
 0x124   : > { %v897_v49 = vadd.f32 %v2418_v48, %v896_v34  ;;  %v1926_v34 = vld [vmem:[#allocation7 + $0x8] sm:$0xff] }
 0x125   : > { %v2528_v35 = vpop.f32.mrf.mxu0 }
 0x126   : > { %v734_v11 = vpop.f32.mrf.mxu1  ;;  %v1925_v35 = vld [vmem:[#allocation7] sm:$0xff] }
 0x127   : > { %v735_v12 = vadd.f32 %v2414_v10, %v734_v11 }
 0x128   : > { %v2506_v13 = vpop.f32.mrf.mxu1 }
 0x129   : > { %900 = vxpose.xlu0.b32.start.end [1/1] (short) (narrow) %v735_v12, 32 }
 0x12e   : > { %v815_v14 = vpop.f32.mrf.mxu1 }
 0x12f   : > { %v816_v17 = vadd.f32 %v2416_v15, %v815_v14 }
 0x130   : > { %v2517_v16 = vpop.f32.mrf.mxu1 }
 0x136   : > { %1060 = vxpose.xlu0.b32.start.end [1/1] (short) (narrow) %v816_v17, 32 }
 0x1a5   : > { %v916_v22 = vpop.trf.xlu0 }
 0x1a6   : > { %932 = vxpose.xlu1.b32.start.end [1/1] (short) (narrow) %v916_v22, 8 }
 0x1a9   : > { %v917_v23 = vpop.trf.xlu0 }
 0x1aa   : > { %964 = vxpose.xlu1.b32.start.end [1/1] (short) (narrow) %v917_v23, 8 }
 0x1ad   : > { %v918_v24 = vpop.trf.xlu0 }
 0x1ae   : > { %996 = vxpose.xlu1.b32.start.end [1/1] (short) (narrow) %v918_v24, 8 }
 0x1b1   : > { %v919_v25 = vpop.trf.xlu0 }
 0x1b2   : > { %1028 = vxpose.xlu1.b32.start.end [1/1] (short) (narrow) %v919_v25, 8 }
 0x1b5   : > { %v1076_v26 = vpop.trf.xlu0 }
 0x1b6   : > { %2530 = vmatpush3.msra.mxu1 %v1076_v26 }
 0x1b7   : > { %2534 = vmatprep.subr.mxu1 %v2888_v0 }
 0x1b9   : > { %v1077_v27 = vpop.trf.xlu0 }
 0x1bd   : > { %v1078_v28 = vpop.trf.xlu0 }
 0x1be   : > { %2540 = vmatpush3.msra.mxu0 %v1078_v28 }
 0x1bf   : > { %2549 = vmatprep.subr.mxu0 %v2888_v0 }
 0x1c1   : > { %v1079_v30 = vpop.trf.xlu0 }
 0x222   : > { %v948_v29 = vpop.trf.xlu1 }
 0x223   : > { %2532 = vmatmul.mubr.msk.f32.vlgmr.msra.gmra.mxu1 %vm1124_vm2, %v948_v29 }
 0x224   : > { %2535 = vmatpush3.msra.mxu1 %v1077_v27  ;;  %2536 = vmatprep.mubr.msk.f32.mxu1 %vm2889_vm1, %v2888_v0 }
 0x225   : > { %2544 = vmatprep.subr.mxu1 %v2888_v0 }
 0x226   : > { %v980_v31 = vpop.trf.xlu1 }
 0x227   : > { %2537 = vmatmul.mubr.msk.f32.vlgmr.msra.gmra.mxu1 %vm1124_vm2, %v980_v31  ;;  %v1927_v31 = vld [vmem:[#allocation7 + $0x10] sm:$0xff] }
 0x228   : > { %2545 = vmatpush3.msra.mxu1 %v1079_v30  ;;  %2546 = vmatprep.mubr.msk.f32.mxu1 %vm2889_vm1, %v2888_v0  ;;  %v1928_v30 = vld [vmem:[#allocation7 + $0x18] sm:$0xff] }
 0x229   : > { %2554 = vmatprep.subr.mxu1 %v2888_v0 }
 0x22a   : > { %v1012_v32 = vpop.trf.xlu1 }
 0x22b   : > { %2542 = vmatmul.mubr.msk.f32.vlgmr.msra.gmra.mxu0 %vm1124_vm2, %v1012_v32 }
 0x22c   : > { %2551 = vmatprep.mubr.msk.f32.mxu0 %vm2889_vm1, %v2888_v0 }
 0x22e   : > { %v1044_v33 = vpop.trf.xlu1 }
 0x22f   : > { %2547 = vmatmul.mubr.msk.f32.vlgmr.msra.gmra.mxu1 %vm1124_vm2, %v1044_v33 }
 0x230   : > { %2556 = vmatprep.mubr.msk.f32.mxu1 %vm2889_vm1, %v2888_v0 }
 0x2e3   : > { %v1194_v36 = vpop.f32.mrf.mxu1 }
 0x2e4   : > { %v1417_v37 = vsel %vm1124_vm2, %v1194_v36, -inf }
 0x2e5   : > { %1418 = vmax.xlane.f32.xlu1 %v1417_v37  ;;  %v2533_v38 = vpop.f32.mrf.mxu1 }
 0x2e7   : > { %v1267_v39 = vpop.f32.mrf.mxu1 }
 0x2e8   : > { %v1420_v40 = vsel %vm1124_vm2, %v1267_v39, -inf }
 0x2e9   : > { %1421 = vmax.xlane.f32.xlu0 %v1420_v40  ;;  %v2538_v41 = vpop.f32.mrf.mxu1 }
 0x2ea   : > { %v2432_v41 = vld [vmem:[%s3361_s8] ss:$0 sm:$0xff] }
 0x2eb   : > { %v1340_v42 = vpop.f32.mrf.mxu0 }
 0x2ec   : > { %v1423_v43 = vsel %vm1124_vm2, %v1340_v42, -inf }
 0x2ed   : > { %v2543_v44 = vpop.f32.mrf.mxu0  ;;  %1424 = vmax.xlane.f32.xlu1 %v1423_v43 }
 0x2ef   : > { %v1413_v45 = vpop.f32.mrf.mxu1 }
 0x2f0   : > { %v1426_v46 = vsel %vm1124_vm2, %v1413_v45, -inf }
 0x2f1   : > { %1427 = vmax.xlane.f32.xlu1 %v1426_v46  ;;  %v2548_v47 = vpop.f32.mrf.mxu1 }
 0x324   : > { %1092 = vxpose.xlu1.b32.start.end [1/1] (short) (narrow) %v897_v49, 32 }
 0x36e   : > { %v1419_v50 = vpop.xlane.xlu1 %1418 }
 0x36f   : > { %v1429_v51 = vsub.f32 %v1194_v36, %v1419_v50 }
 0x371   : > { %v1433_v52 = vmul.f32 1.442695, %v1429_v51 }
 0x372   : > { %v1422_v53 = vpop.xlane.xlu0 %1421 }
 0x373   : > { %2697 = vpow2.f32 %v1433_v52  ;;  %v1430_v54 = vsub.f32 %v1267_v39, %v1422_v53  ;;  %v2046_v52 = vld [vmem:[#allocation9 + $0x18] sm:$0xff]  ;;  %v2045_v53 = vld [vmem:[#allocation9 + $0x10] sm:$0xff] }
 0x375   : > { %v1435_v55 = vmul.f32 1.442695, %v1430_v54  ;;  %v2044_v54 = vld [vmem:[#allocation9 + $0x8] sm:$0xff] }
 0x376   : > { %v1425_v56 = vpop.xlane.xlu1 %1424 }
 0x377   : > { %2699 = vpow2.f32 %v1435_v55  ;;  %v1431_v57 = vsub.f32 %v1340_v42, %v1425_v56  ;;  %v2137_v55 = vld [vmem:[%s3366_s13 + $0x38] sm:$0xff]  ;;  %v2136_v56 = vld [vmem:[%s3366_s13 + $0x30] sm:$0xff] }
 0x379   : > { %v1437_v58 = vmul.f32 1.442695, %v1431_v57  ;;  %v2135_v57 = vld [vmem:[%s3366_s13 + $0x28] sm:$0xff] }
 0x37a   : > { %v1428_v59 = vpop.xlane.xlu1 %1427 }
 0x37b   : > { %2701 = vpow2.f32 %v1437_v58  ;;  %v1432_v60 = vsub.f32 %v1413_v45, %v1428_v59  ;;  %v2134_v58 = vld [vmem:[%s3366_s13 + $0x20] sm:$0xff]  ;;  %v2133_v59 = vld [vmem:[%s3366_s13 + $0x18] sm:$0xff] }
 0x37d   : > { %v1439_v61 = vmul.f32 1.442695, %v1432_v60 }
 0x37f   : > { %2703 = vpow2.f32 %v1439_v61 }
 0x380   : > { %v2698_v62 = vpop.eup %2697 }
 0x381   : > { %v1441_v63 = vsel %vm1124_vm2, %v2698_v62, 0.0 }
 0x382   : > { %1442 = vadd.xlane.f32.xlu0 %v1441_v63 }
 0x384   : > { %v2700_v1 = vpop.eup %2699 }
 0x385   : > { %v1444_v2 = vsel %vm1124_vm2, %v2700_v1, 0.0 }
 0x386   : > { %1445 = vadd.xlane.f32.xlu0 %v1444_v2 }
 0x388   : > { %v2702_v3 = vpop.eup %2701 }
 0x389   : > { %v1447_v4 = vsel %vm1124_vm2, %v2702_v3, 0.0 }
 0x38a   : > { %1448 = vadd.xlane.f32.xlu0 %v1447_v4 }
 0x38c   : > { %v2704_v6 = vpop.eup %2703 }
 0x38d   : > { %v1450_v7 = vsel %vm1124_vm2, %v2704_v6, 0.0 }
 0x38e   : > { %1451 = vadd.xlane.f32.xlu0 %v1450_v7 }
 0x3a0   : > { %v1108_v8 = vpop.trf.xlu1 }
 0x3a1   : > { %2550 = vmatpush3.xpose.msk.msra.mxu0 %vm1124_vm2, %v1108_v8  ;;  %v2132_v8 = vld [vmem:[%s3366_s13 + $0x10] sm:$0xff] }
 0x3a2   : > { %2559 = vmatprep.subr.mxu0 %v2888_v0 }
 0x3a4   : > { %2552 = vmatmul.mubr.msk.f32.vlgmr.msra.gmra.mxu0 %vm1124_vm2, %v2698_v62  ;;  %v1109_v9 = vpop.trf.xlu1 }
 0x3a5   : > { %2555 = vmatpush3.xpose.msk.msra.mxu1 %vm1124_vm2, %v1109_v9  ;;  %2561 = vmatprep.mubr.msk.f32.mxu0 %vm2889_vm1, %v2888_v0  ;;  %v2131_v9 = vld [vmem:[%s3366_s13 + $0x8] sm:$0xff] }
 0x3a6   : > { %2564 = vmatprep.subr.mxu1 %v2888_v0 }
 0x3a8   : > { %2557 = vmatmul.mubr.msk.f32.vlgmr.msra.gmra.mxu1 %vm1124_vm2, %v2700_v1  ;;  %v1110_v10 = vpop.trf.xlu1  ;;  %v2434_v1 = vld [vmem:[%s3362_s9] ss:$0 sm:$0xff] }
 0x3a9   : > { %2560 = vmatpush3.xpose.msk.msra.mxu0 %vm1124_vm2, %v1110_v10  ;;  %2566 = vmatprep.mubr.msk.f32.mxu1 %vm2889_vm1, %v2888_v0  ;;  %v2130_v10 = vld [vmem:[%s3366_s13] sm:$0xff] }
 0x3aa   : > { %2569 = vmatprep.subr.mxu0 %v2888_v0 }
 0x3ac   : > { %2562 = vmatmul.mubr.msk.f32.vlgmr.msra.gmra.mxu0 %vm1124_vm2, %v2702_v3  ;;  %v1111_v11 = vpop.trf.xlu1  ;;  %v2435_v3 = vld [vmem:[%s3363_s10] ss:$0 sm:$0xff] }
 0x3ad   : > { %2565 = vmatpush3.xpose.msk.msra.mxu1 %vm1124_vm2, %v1111_v11  ;;  %2577 = vmatprep.mubr.msk.f32.mxu0 %vm2889_vm1, %v2888_v0  ;;  %v2436_v11 = vld [vmem:[%s3408_s17] ss:$0 sm:$0xff] }
 0x3ae   : > { %2580 = vmatprep.subr.mxu1 %v2888_v0  ;;  %2570 = vmatpush3.msra.mxu0 %v1928_v30 }
 0x3af   : > { %2571 = vmatprep.subr.mxu0 %v2888_v0 }
 0x3b0   : > { %2567 = vmatmul.mubr.msk.f32.vlgmr.msra.gmra.mxu1 %vm1124_vm2, %v2704_v6  ;;  %2572 = vmatpush3.msra.mxu0 %v1927_v31 }
 0x3b1   : > { %2588 = vmatprep.mubr.msk.f32.mxu1 %vm2889_vm1, %v2888_v0  ;;  %2573 = vmatprep.subr.mxu0 %v2888_v0 }
 0x3b2   : > { %2574 = vmatpush3.msra.mxu0 %v1926_v34  ;;  %2581 = vmatpush3.msra.mxu1 %v2046_v52 }
 0x3b3   : > { %2575 = vmatprep.subr.mxu0 %v2888_v0  ;;  %2582 = vmatprep.subr.mxu1 %v2888_v0 }
 0x3b4   : > { %2576 = vmatpush3.msra.mxu0 %v1925_v35  ;;  %2583 = vmatpush3.msra.mxu1 %v2045_v53  ;;  %v2441_v35 = vld [vmem:[%s3412_s19] ss:$0 sm:$0xff] }
 0x3b5   : > { %2591 = vmatprep.subr.mxu0 %v2888_v0  ;;  %2584 = vmatprep.subr.mxu1 %v2888_v0 }
 0x3b6   : > { %2585 = vmatpush3.msra.mxu1 %v2044_v54 }
 0x3b7   : > { %2586 = vmatprep.subr.mxu1 %v2888_v0 }
 0x40b   : > { %v1443_v12 = vpop.xlane.xlu0 %1442 }
 0x40c   : > { %2705 = vrcp.f32 %v1443_v12 }
 0x40f   : > { %v1446_v13 = vpop.xlane.xlu0 %1445 }
 0x410   : > { %2707 = vrcp.f32 %v1446_v13 }
 0x413   : > { %v1449_v14 = vpop.xlane.xlu0 %1448 }
 0x414   : > { %2709 = vrcp.f32 %v1449_v14 }
 0x417   : > { %v1452_v15 = vpop.xlane.xlu0 %1451 }
 0x418   : > { %2711 = vrcp.f32 %v1452_v15 }
 0x419   : > { %v2706_v16 = vpop.eup %2705 }
 0x41d   : > { %v2708_v20 = vpop.eup %2707 }
 0x421   : > { %v2710_v24 = vpop.eup %2709 }
 0x425   : > { %v2712_v28 = vpop.eup %2711 }
 0x464   : > { %v1525_v17 = vpop.f32.mrf.mxu0 }
 0x465   : > { %v1758_v18 = vmul.f32 %v2706_v16, %v1525_v17  ;;  %v2129_v16 = vld [vmem:[#allocation3] sm:$0xff] }
 0x466   : > { %v2553_v19 = vpop.f32.mrf.mxu0 }
 0x467   : > { %1765 = vxpose.xlu0.b32.start.end [1/1] (short) (narrow) %v1758_v18, 8 }
 0x468   : > { %v1601_v21 = vpop.f32.mrf.mxu1 }
 0x469   : > { %v1760_v22 = vmul.f32 %v2708_v20, %v1601_v21 }
 0x46a   : > { %v2558_v23 = vpop.f32.mrf.mxu1 }
 0x46b   : > { %1797 = vxpose.xlu1.b32.start.end [1/1] (short) (narrow) %v1760_v22, 8 }
 0x46c   : > { %v1677_v25 = vpop.f32.mrf.mxu0 }
 0x46d   : > { %v1762_v26 = vmul.f32 %v2710_v24, %v1677_v25 }
 0x46e   : > { %v2563_v27 = vpop.f32.mrf.mxu0 }
 0x46f   : > { %1829 = vxpose.xlu1.b32.start.end [1/1] (short) (narrow) %v1762_v26, 8 }
 0x470   : > { %v1753_v29 = vpop.f32.mrf.mxu1 }
 0x471   : > { %v1764_v32 = vmul.f32 %v2712_v28, %v1753_v29 }
 0x472   : > { %v2568_v33 = vpop.f32.mrf.mxu1 }
 0x473   : > { %1861 = vxpose.xlu1.b32.start.end [1/1] (short) (narrow) %v1764_v32, 8  ;;  %v2440_v33 = vld [vmem:[%s3411_s20] ss:$0 sm:$0xff]  ;;  %s2890_s20 = smov [#allocation10]  }
 0x474   : > { %s2801_s1 = sshll.u32 %s2890_s20, 4  ;;  %s2802_s1 = int_to_ptr.vmem [resolvable:$false] %s2801_s1 }
 0x475   : > { %s2803_s0 = scalar_lea.vmem %s2802_s1, 256  ;;  %p2804_p2 = scmp.lt.s32.totalorder %s2274_s7, %s2802_s1 }
 0x476   : > { %p2805_p13 = scmp.lt.s32.totalorder %s2803_s0, %s2797_s15 }
 0x478   : > { %p2806_p0 = por %p2805_p13, %p2804_p2 }
 0x47a   : > { %p2807_p5 = pnand %p2806_p0, %p2800_p11 }
 0x4e3   : > { %v1781_v36 = vpop.trf.xlu0 }
 0x4e4   : > { %1893 = vxpose.xlu0.b32.start [1/4] (short) (narrow) %v1781_v36, 8 }
 0x4e7   : > { %v1813_v37 = vpop.trf.xlu1 }
 0x4e8   : > { %1894 = vxpose.xlu0.b32.cont [2/4] (short) (narrow) %v1813_v37, 8 }
 0x4eb   : > { %v1845_v38 = vpop.trf.xlu1 }
 0x4ec   : > { %1895 = vxpose.xlu0.b32.cont [3/4] (short) (narrow) %v1845_v38, 8 }
 0x4ef   : > { %v1877_v39 = vpop.trf.xlu1 }
 0x4f0   : > { %1896 = vxpose.xlu0.b32.end [4/4] (short) (narrow) %v1877_v39, 8 }
 0x560   : > { %v1909_v40 = vpop.trf.xlu0 }
 0x561   : > { %2578 = vmatmul.mubr.msk.f32.vlgmr.msra.gmra.mxu0 %vm664_vm0, %v1909_v40 }
 0x562   : > { %2607 = vmatprep.mubr.msk.f32.mxu0 %vm2889_vm1, %v2888_v0  ;;  %2592 = vmatpush3.msra.mxu0 %v2137_v55 }
 0x563   : > { %2593 = vmatprep.subr.mxu0 %v2888_v0 }
 0x564   : > { %2594 = vmatpush3.msra.mxu0 %v2136_v56 }
 0x565   : > { %2595 = vmatprep.subr.mxu0 %v2888_v0 }
 0x566   : > { %2596 = vmatpush3.msra.mxu0 %v2135_v57 }
 0x567   : > { %2597 = vmatprep.subr.mxu0 %v2888_v0 }
 0x568   : > { %2598 = vmatpush3.msra.mxu0 %v2134_v58 }
 0x569   : > { %2599 = vmatprep.subr.mxu0 %v2888_v0 }
 0x56a   : > { %2600 = vmatpush3.msra.mxu0 %v2133_v59 }
 0x56b   : > { %2601 = vmatprep.subr.mxu0 %v2888_v0 }
 0x56c   : > { %2602 = vmatpush3.msra.mxu0 %v2132_v8 }
 0x56d   : > { %2603 = vmatprep.subr.mxu0 %v2888_v0 }
 0x56e   : > { %2604 = vmatpush3.msra.mxu0 %v2131_v9 }
 0x56f   : > { %2605 = vmatprep.subr.mxu0 %v2888_v0  ;;  %v2439_v0 = vld [vmem:[%s3409_s12] ss:$0 sm:$0xff]  ;;  %s2271_s12 = scalar_lea.hbm %s3413_s11, %s2443_s23 }
 0x570   : > { %2606 = vmatpush3.msra.mxu0 %v2130_v10 }
 0x621   : > { %v2005_v42 = vpop.f32.mrf.mxu0 }
 0x622   : > { %v2006_v43 = vadd.f32 %v2432_v41, %v2005_v42 }
 0x623   : > { %v2579_v44 = vpop.f32.mrf.mxu0 }
 0x624   : > { %v2009_v45 = vadd.f32 %v2006_v43, %v3139_v5  ;;  %v2043_v5 = vld [vmem:[#allocation9] sm:$0xff] }
 0x625   : > { %2587 = vmatpush3.msra.mxu1 %v2043_v5 }
 0x626   : > { %v2012_v46 = vsel %vm664_vm0, %v2009_v45, 0.0 }
 0x627   : > { %2013 = vadd.xlane.f32.xlu1 %v2012_v46 }
 0x6b0   : > { %v2014_v47 = vpop.xlane.xlu1 %2013 }
 0x6b1   : > { %v2016_v48 = vmul.f32 0.03125, %v2014_v47 }
 0x6b3   : > { %v2017_v49 = vsub.f32 %v2009_v45, %v2016_v48 }
 0x6b5   : > { %v2018_v50 = vmul.f32 %v2017_v49, %v2017_v49 }
 0x6b7   : > { %v2019_v51 = vsel %vm664_vm0, %v2018_v50, 0.0 }
 0x6b8   : > { %2020 = vadd.xlane.f32.xlu0 %v2019_v51 }
 0x741   : > { %v2021_v60 = vpop.xlane.xlu0 %2020 }
 0x742   : > { %v2022_v61 = vmul.f32 0.03125, %v2021_v60 }
 0x744   : > { %v2023_v62 = vadd.f32 1e-05, %v2022_v61 }
 0x746   : > { %2713 = vrsqrt.f32 %v2023_v62 }
 0x753   : > { %v2714_v63 = vpop.eup %2713 }
 0x754   : > { %v2025_v2 = vmul.f32 %v2714_v63, %v2017_v49 }
 0x756   : > { %v2032_v4 = vmul.f32 %v2434_v1, %v2025_v2 }
 0x758   : > { %v2039_v6 = vadd.f32 %v2435_v3, %v2032_v4 }
 0x75a   : > { %2040 = vst.msk [vmem:[#allocation2] sm:$0xff] %vm664_vm0, %v2039_v6 }
 0x761   : > { %v2042_v7 = vld [vmem:[#allocation2] sm:$0xff] }
 0x762   : > { %2589 = vmatmul.mubr.msk.f32.vlgmr.msra.gmra.mxu1 %vm664_vm0, %v2042_v7 }
 0x822   : > { %v2124_v12 = vpop.f32.mrf.mxu1 }
 0x823   : > { %v2125_v13 = vadd.f32 %v2436_v11, %v2124_v12 }
 0x824   : > { %v2590_v14 = vpop.f32.mrf.mxu1 }
 0x825   : > { %v2128_v15 = vmax.f32 %v2125_v13, 0.0 }
 0x827   : > { %2608 = vmatmul.mubr.msk.f32.vlgmr.msra.gmra.mxu0 %vm2138_vm3, %v2128_v15 }
 0x8e7   : > { %v2208_v17 = vpop.f32.mrf.mxu0 }
 0x8e8   : > { %v2212_v18 = vadd.f32 %v2208_v17, %v2129_v16 }
 0x8e9   : > { %v2609_v19 = vpop.f32.mrf.mxu0 }
 0x8ea   : > { %2213 = vst.msk [vmem:[#allocation3] sm:$0xff] %vm664_vm0, %v2212_v18 }
 0x8f1   : > { %v2217_v20 = vld [vmem:[#allocation3] sm:$0xff] }
 0x8f2   : > { %v2225_v21 = vadd.f32 %v2439_v0, %v2217_v20 }
 0x8f4   : > { %v2227_v22 = vadd.f32 %v2225_v21, %v2042_v7 }
 0x8f6   : > { %v2230_v23 = vsel %vm664_vm0, %v2227_v22, 0.0 }
 0x8f7   : > { %2231 = vadd.xlane.f32.xlu1 %v2230_v23 }
 0x980   : > { %v2232_v24 = vpop.xlane.xlu1 %2231 }
 0x981   : > { %v2234_v25 = vmul.f32 0.03125, %v2232_v24 }
 0x983   : > { %v2235_v26 = vsub.f32 %v2227_v22, %v2234_v25 }
 0x985   : > { %v2236_v27 = vmul.f32 %v2235_v26, %v2235_v26 }
 0x987   : > { %v2237_v28 = vsel %vm664_vm0, %v2236_v27, 0.0 }
 0x988   : > { %2238 = vadd.xlane.f32.xlu1 %v2237_v28 }
 0xa11   : > { %v2239_v29 = vpop.xlane.xlu1 %2238 }
 0xa12   : > { %v2240_v30 = vmul.f32 0.03125, %v2239_v29 }
 0xa14   : > { %v2241_v31 = vadd.f32 1e-05, %v2240_v30 }
 0xa16   : > { %2715 = vrsqrt.f32 %v2241_v31 }
 0xa23   : > { %v2716_v32 = vpop.eup %2715 }
 0xa24   : > { %v2243_v34 = vmul.f32 %v2716_v32, %v2235_v26 }
 0xa26   : > { %v2250_v36 = vmul.f32 %v2440_v33, %v2243_v34 }
 0xa28   : > { %v2257_v37 = vadd.f32 %v2441_v35, %v2250_v36 }
 0xa2a   : > { %2258 = vst.msk [vmem:[%s638_s16] sm:$0xff] %vm664_vm0, %v2257_v37 }
 0xa2b   : > { %2810 = shalt.err (!%p2807_p5)
}
 0xa2c   : > { %s2811_s30 = scalar_lea.hbm %s2271_s12, 128  ;;  %s2815_s19 = scalar_lea.hbm %s3413_s11, 256 }
 0xa2d   : > { %p2812_p10 = scmp.ne.s32.totalorder %s2271_s12, %s2811_s30  ;;  %p2816_p6 = scmp.lt.s32.totalorder %s2271_s12, %s3413_s11 }
 0xa2e   : > { %p2817_p12 = scmp.lt.s32.totalorder %s2815_s19, %s2811_s30 }
 0xa2f   : > { %p2813_p1 = pnand %p2812_p10, %p3076_p7 }
 0xa30   : > { %p2818_p3 = por %p2817_p12, %p2816_p6 }
 0xa31   : > { %p2814_p4 = pneg %p2813_p1 }
 0xa33   : > { %p2819_p8 = pnand %p2818_p3, %p2814_p4 }
 0xa35   : > { %2822 = shalt.err (!%p2819_p8)
}
 0xa36   : > { %2620 = dma.vmem_to_hbm [thread:$0]  (%p3076_p7), %s2274_s7, 128, %s2271_s12, %s2260_s21  }
 0xa37 PF: > { %s3414_s17 = sld [smem:[#allocation14_spill]]  ;;  %p3417_p11 = scmp.ge.s32.totalorder %s2881_s29, 2 }
 0xa38   : > { %s3415_s28 = sld [smem:[#allocation17_spill]] }
 0xa3d   : > { %s2285_s15 = sand.u32 1, %s3414_s17  }
 0xa3e   : > { %p3416_p9 = scmp.ne.s32.totalorder %s3415_s28, 0  ;;  %s2286_s20 = scalar_lea.sflag [#allocation6], %s2285_s15 }
 0xa40   : > { %p2634_p2 = pnand %p3417_p11, %p3416_p9 }
 0xa42   : > { %p2635_p13 = pneg %p2634_p2 }
 0xa44   : > { %2856 = dma.done.wait (%p2635_p13), %s2286_s20, 128  }
 0xa45   : > { %2858 = vsyncadd (%p2635_p13), %s2286_s20, 4294967168  ;;  %s34_s29 = sadd.s32 1, %s2881_s29   ;;  %s3418_s27 = sld [smem:[#allocation16_spill]] }
 0xa46   : > { %p31_p0 = scmp.ge.s32.totalorder %s34_s29, 4   ;;  %s3419_s28 = sld [smem:[#allocation18_spill]] }
 0xa47   : > { %s3420_s24 = smov %s2865_s25  ;;  %s3421_s25 = smov %s2869_s26 }
 0xa48   : > { %s3422_s26 = smov %s3085_s22  ;;  %33 = sbr.rel (!%p31_p0) target bundleno = 17 (0x11), region = 156 }
 0xa4d   :  { %2291 = vsyncpa [#allocation5], 1 }
 0xa4e   :  { %2293 = vsyncpa [#allocation5 + $0x1], 1 }
 0xa4f   :  { %2294 = vsyncpa [#allocation8], 1 }
 0xa50   :  { %2295 = vsyncpa [#allocation6], 1 }
 0xa51   :  { %2297 = vsyncpa [#allocation6 + $0x1], 1 }

</bundles_post_ra>
